<compile_context>
chip_gen: v7x
topology: tpu7x:2x2x1
jax: 0.10.0
libtpu: 0.0.40
codegen_flags: <defaults>
</compile_context>

<pallas_src>
import jax
import jax.numpy as jnp
from jax.experimental import pallas as pl
from jax.experimental.pallas import tpu as pltpu

INPUT_SIZE = 7
HIDDEN = 64
OUTPUT_SIZE = 7

HP = 128            # lane-padded per-gate width (vreg lane count)
G4 = 4 * HP         # 512 gate columns, PyTorch order [i, f, g, o]
OUT_P = 128         # lane-padded output width
FB = INPUT_SIZE + 1  # input features + constant-1 bias column = 8 (one sublane tile)


def lstm_fc_kernel(x_ref, wih_ref, whh_ref, fc_ref, o_ref, gx_ref):
    """Full LSTM recurrence + final Linear on the last hidden state.

    x_ref:   (T*BP, FB) f32  time-major flattened input; column FB-1 is constant 1.0
                             (folds the LSTM bias into the input projection).
    wih_ref: (FB, G4)   f32  rows [0:7) = W_ih^T (gate cols padded 64->128 lanes),
                             row 7 = b_ih + b_hh (padded lanes zero).
    whh_ref: (HP, G4)   bf16 W_hh^T (rows 64..127 and padded gate cols zero).
    fc_ref:  (HP+8, OUT_P) f32  rows [0:HP) = fc.weight^T (real block [:64, :7]),
                                row HP = fc.bias (cols 7..127 zero).
    o_ref:   (BP, OUT_P) f32 lane-dense padded output; real result in [:B, :OUTPUT_SIZE].
    gx_ref:  (T, BP, G4) f32 VMEM scratch holding the hoisted input projection.
    """
    BP = o_ref.shape[0]
    T = gx_ref.shape[0]

    # Hoisted input projection (+ bias via the ones column): ONE matmul for all T
    # steps, stored to VMEM scratch so it is not a 32-vreg live value across the loop.
    gx = jnp.dot(x_ref[...], wih_ref[...], preferred_element_type=jnp.float32)  # (T*BP, G4)
    gx_ref[...] = gx.reshape(T, BP, G4)

    h = jnp.zeros((BP, HP), jnp.float32)
    c = jnp.zeros((BP, HP), jnp.float32)

    # T is small and static: unroll at trace time.  Per step: one VMEM tile read of
    # gx, one bf16xbf16 MXU dot (f32 accum), and VPU/EUP elementwise.
    # (If T ever grows past ~32, switch to lax.fori_loop(..., unroll=4).)
    for t in range(T):
        gates = gx_ref[t] + jnp.dot(
            h.astype(jnp.bfloat16), whh_ref[...],
            preferred_element_type=jnp.float32)                    # (BP, G4) f32
        # 128-lane-aligned gate slices, PyTorch order [i, f, g, o].
        i_g = jax.nn.sigmoid(gates[:, 0 * HP:1 * HP])
        f_g = jax.nn.sigmoid(gates[:, 1 * HP:2 * HP])
        g_g = jnp.tanh(gates[:, 2 * HP:3 * HP])
        o_g = jax.nn.sigmoid(gates[:, 3 * HP:4 * HP])
        c = f_g * c + i_g * g_g
        h = o_g * jnp.tanh(c)

    # FC weights are only loaded AFTER the recurrence (no live range across the loop).
    wfc = fc_ref[0:HP, :]                                          # (HP, OUT_P)
    bfc = fc_ref[HP:HP + 1, :]                                     # (1, OUT_P)
    out = jnp.dot(h, wfc, preferred_element_type=jnp.float32) + bfc
    o_ref[...] = out.astype(o_ref.dtype)


def financial_model_forward(x, packed_params):
    """x: (B, T, INPUT_SIZE) float32, batch_first like the PyTorch module."""
    wih_slab, whh_slab, fc_slab = packed_params
    B, T, F = x.shape
    assert F == INPUT_SIZE
    BP = max(8, ((B + 7) // 8) * 8)  # pad batch to a full sublane tile

    # Time-major, batch padded to BP rows, with a constant 1.0 column appended so the
    # LSTM bias folds into the hoisted input projection.  (A production data pipeline
    # should supply this layout directly and skip the transpose/pad copy.)
    x_tm = jnp.zeros((T, BP, FB), jnp.float32)
    x_tm = x_tm.at[:, :, INPUT_SIZE].set(1.0)
    x_tm = x_tm.at[:, :B, :INPUT_SIZE].set(
        jnp.transpose(x, (1, 0, 2)).astype(jnp.float32))
    x_flat = x_tm.reshape(T * BP, FB)

    vmem = pl.BlockSpec(memory_space=pltpu.MemorySpace.VMEM)
    out_p = pl.pallas_call(
        lstm_fc_kernel,
        out_shape=jax.ShapeDtypeStruct((BP, OUT_P), jnp.float32),
        in_specs=[vmem, vmem, vmem, vmem],
        out_specs=vmem,
        scratch_shapes=[pltpu.VMEM((T, BP, G4), jnp.float32)],
    )(x_flat, wih_slab, whh_slab, fc_slab)
    return out_p[:B, :OUTPUT_SIZE]


def init_params(key):
    """Deterministic PyTorch-style init: U(-1/sqrt(H), 1/sqrt(H)) for all params."""
    k = 1.0 / jnp.sqrt(jnp.float32(HIDDEN))
    ks = jax.random.split(key, 6)
    w_ih = jax.random.uniform(ks[0], (4 * HIDDEN, INPUT_SIZE), jnp.float32, -k, k)
    w_hh = jax.random.uniform(ks[1], (4 * HIDDEN, HIDDEN), jnp.float32, -k, k)
    b_ih = jax.random.uniform(ks[2], (4 * HIDDEN,), jnp.float32, -k, k)
    b_hh = jax.random.uniform(ks[3], (4 * HIDDEN,), jnp.float32, -k, k)
    w_fc = jax.random.uniform(ks[4], (OUTPUT_SIZE, HIDDEN), jnp.float32, -k, k)
    b_fc = jax.random.uniform(ks[5], (OUTPUT_SIZE,), jnp.float32, -k, k)
    return (w_ih, w_hh, b_ih, b_hh, w_fc, b_fc)


def pack_params(raw):
    """Pack raw PyTorch-layout params into the lane-aligned kernel slabs.

    INVARIANT (load-bearing): for every gate, columns [64:128) of wih_slab (including
    the bias row) and of whh_slab, and rows [64:128) of whh_slab, must be EXACTLY 0.
    This guarantees the padded lanes of the gate pre-activations are 0, hence
    c_pad = h_pad = 0 for all timesteps, hence the padded FC-input lanes contribute
    nothing.  Any later change (e.g. a forget-gate bias of 1.0) must be applied to the
    real 64 lanes only.
    """
    w_ih, w_hh, b_ih, b_hh, w_fc, b_fc = raw
    b = b_ih + b_hh

    # W_ih^T + bias slab: (FB, G4) f32.  Row INPUT_SIZE is the combined bias, folded
    # into the input projection via the constant 1.0 column appended to x.
    wih_slab = jnp.zeros((FB, G4), jnp.float32)
    # W_hh^T slab: (HP, G4), stored in bf16 (MXU operands; f32 accumulation in-kernel).
    whh_slab = jnp.zeros((HP, G4), jnp.float32)
    for g in range(4):
        wi_g = w_ih[g * HIDDEN:(g + 1) * HIDDEN, :].T      # (F, H)
        wh_g = w_hh[g * HIDDEN:(g + 1) * HIDDEN, :].T      # (H, H)
        b_g = b[g * HIDDEN:(g + 1) * HIDDEN]               # (H,)
        wih_slab = wih_slab.at[0:INPUT_SIZE, g * HP:g * HP + HIDDEN].set(wi_g)
        wih_slab = wih_slab.at[INPUT_SIZE, g * HP:g * HP + HIDDEN].set(b_g)
        whh_slab = whh_slab.at[0:HIDDEN, g * HP:g * HP + HIDDEN].set(wh_g)
    whh_slab = whh_slab.astype(jnp.bfloat16)

    # FC slab: (HP + 8, OUT_P) f32.
    fc_slab = jnp.zeros((HP + 8, OUT_P), jnp.float32)
    fc_slab = fc_slab.at[0:HIDDEN, 0:OUTPUT_SIZE].set(w_fc.T)
    fc_slab = fc_slab.at[HP, 0:OUTPUT_SIZE].set(b_fc)
    return wih_slab, whh_slab, fc_slab


def reference_forward(x, raw):
    """Pure-JAX f32 reference (same math as torch.nn.LSTM + Linear) for validation."""
    w_ih, w_hh, b_ih, b_hh, w_fc, b_fc = raw
    B, T, _ = x.shape
    wih_t = w_ih.T                       # (F, 4H)
    whh_t = w_hh.T                       # (H, 4H)
    bias = (b_ih + b_hh)[None, :]        # (1, 4H)
    h = jnp.zeros((B, HIDDEN), jnp.float32)
    c = jnp.zeros((B, HIDDEN), jnp.float32)

    def step(carry, x_t):
        h, c = carry
        gates = x_t @ wih_t + h @ whh_t + bias
        i_g = jax.nn.sigmoid(gates[:, 0 * HIDDEN:1 * HIDDEN])
        f_g = jax.nn.sigmoid(gates[:, 1 * HIDDEN:2 * HIDDEN])
        g_g = jnp.tanh(gates[:, 2 * HIDDEN:3 * HIDDEN])
        o_g = jax.nn.sigmoid(gates[:, 3 * HIDDEN:4 * HIDDEN])
        c = f_g * c + i_g * g_g
        h = o_g * jnp.tanh(c)
        return (h, c), None

    (h, _), _ = jax.lax.scan(step, (h, c), jnp.transpose(x, (1, 0, 2)))
    return h @ w_fc.T + b_fc[None, :]


if __name__ == "__main__":
    key = jax.random.PRNGKey(0)
    k_param, k_x = jax.random.split(key)

    B, T = 2, 8
    x = jax.random.normal(k_x, (B, T, INPUT_SIZE), jnp.float32)

    raw_params = init_params(k_param)
    packed = pack_params(raw_params)

    fwd = jax.jit(financial_model_forward)
    out = jax.block_until_ready(fwd(x, packed))

    ref = jax.block_until_ready(reference_forward(x, raw_params))
    assert out.shape == (B, OUTPUT_SIZE)
    # Tolerance loosened vs the strict-f32 reference because W_hh / h are bf16 MXU
    # operands (f32 accumulation); observed error is well below this bound.
    max_err = float(jnp.max(jnp.abs(out - ref)))
    assert max_err < 2e-2, f"kernel/reference mismatch, max abs err {max_err}"

    print("KERNEL_OK")
</pallas_src>

<mosaic_0001>
module attributes {stable_mosaic.version = 11 : i64} {
  func.func @lstm_fc_kernel(%arg0: memref<64x8xf32, #tpu.memory_space<vmem>>, %arg1: memref<8x512xf32, #tpu.memory_space<vmem>>, %arg2: memref<128x512xbf16, #tpu.memory_space<vmem>>, %arg3: memref<136x128xf32, #tpu.memory_space<vmem>>, %arg4: memref<8x128xf32, #tpu.memory_space<vmem>>, %arg5: memref<8x8x512xf32, #tpu.memory_space<vmem>>) attributes {dimension_semantics = [], scalar_prefetch = 0 : i64, scratch_operands = 1 : i64, tpu.core_type = #tpu.core_type<tc>} {
    %c0 = arith.constant 0 : index
    %c0_0 = arith.constant 0 : index
    %0 = vector.load %arg0[%c0, %c0_0] : memref<64x8xf32, #tpu.memory_space<vmem>>, vector<64x8xf32>
    %c0_1 = arith.constant 0 : index
    %c0_2 = arith.constant 0 : index
    %1 = vector.load %arg1[%c0_1, %c0_2] : memref<8x512xf32, #tpu.memory_space<vmem>>, vector<8x512xf32>
    %cst = arith.constant dense<0.000000e+00> : vector<64x512xf32>
    %2 = tpu.matmul %0, %1, %cst {dimension_numbers = #tpu.dot_dimension_numbers<[1], [0], [0], [1], [0, 0, 1, 1], [], []>} : vector<64x8xf32>, vector<8x512xf32>, vector<64x512xf32> -> vector<64x512xf32>
    %3 = vector.shape_cast %2 : vector<64x512xf32> to vector<8x8x512xf32>
    %c0_3 = arith.constant 0 : index
    %c0_4 = arith.constant 0 : index
    %c0_5 = arith.constant 0 : index
    %4 = vector.load %arg5[%c0_3, %c0_4, %c0_5] : memref<8x8x512xf32, #tpu.memory_space<vmem>>, vector<8x8x512xf32>
    tpu.vector_store %arg5[%c0_3, %c0_4, %c0_5], %3 {strides = array<i32>} : memref<8x8x512xf32, #tpu.memory_space<vmem>>, vector<8x8x512xf32>,
    %cst_6 = arith.constant 0.000000e+00 : f32
    %5 = vector.broadcast %cst_6 : f32 to vector<8x128xf32>
    %cst_7 = arith.constant 0.000000e+00 : f32
    %6 = vector.broadcast %cst_7 : f32 to vector<8x128xf32>
    %c0_8 = arith.constant 0 : index
    %c0_9 = arith.constant 0 : index
    %c0_10 = arith.constant 0 : index
    %7 = vector.load %arg5[%c0_8, %c0_9, %c0_10] : memref<8x8x512xf32, #tpu.memory_space<vmem>>, vector<1x8x512xf32>
    %8 = vector.shape_cast %7 : vector<1x8x512xf32> to vector<8x512xf32>
    %9 = arith.truncf %5 : vector<8x128xf32> to vector<8x128xbf16>
    %c0_11 = arith.constant 0 : index
    %c0_12 = arith.constant 0 : index
    %10 = vector.load %arg2[%c0_11, %c0_12] : memref<128x512xbf16, #tpu.memory_space<vmem>>, vector<128x512xbf16>
    %cst_13 = arith.constant dense<0.000000e+00> : vector<8x512xf32>
    %11 = tpu.matmul %9, %10, %cst_13 {dimension_numbers = #tpu.dot_dimension_numbers<[1], [0], [0], [1], [0, 0, 1, 1], [], []>} : vector<8x128xbf16>, vector<128x512xbf16>, vector<8x512xf32> -> vector<8x512xf32>
    %12 = arith.addf %8, %11 : vector<8x512xf32>
    %13 = vector.extract_strided_slice %12 {offsets = [0, 0], sizes = [8, 128], strides = [1, 1]} : vector<8x512xf32> to vector<8x128xf32>
    %14 = arith.negf %13 : vector<8x128xf32>
    %15 = math.exp %14 : vector<8x128xf32>
    %cst_14 = arith.constant 1.000000e+00 : f32
    %16 = vector.broadcast %cst_14 : f32 to vector<8x128xf32>
    %17 = arith.addf %16, %15 : vector<8x128xf32>
    %18 = arith.divf %16, %17 : vector<8x128xf32>
    %19 = vector.extract_strided_slice %12 {offsets = [0, 128], sizes = [8, 128], strides = [1, 1]} : vector<8x512xf32> to vector<8x128xf32>
    %20 = arith.negf %19 : vector<8x128xf32>
    %21 = math.exp %20 : vector<8x128xf32>
    %cst_15 = arith.constant 1.000000e+00 : f32
    %22 = vector.broadcast %cst_15 : f32 to vector<8x128xf32>
    %23 = arith.addf %22, %21 : vector<8x128xf32>
    %24 = arith.divf %22, %23 : vector<8x128xf32>
    %25 = vector.extract_strided_slice %12 {offsets = [0, 256], sizes = [8, 128], strides = [1, 1]} : vector<8x512xf32> to vector<8x128xf32>
    %26 = math.tanh %25 : vector<8x128xf32>
    %27 = vector.extract_strided_slice %12 {offsets = [0, 384], sizes = [8, 128], strides = [1, 1]} : vector<8x512xf32> to vector<8x128xf32>
    %28 = arith.negf %27 : vector<8x128xf32>
    %29 = math.exp %28 : vector<8x128xf32>
    %cst_16 = arith.constant 1.000000e+00 : f32
    %30 = vector.broadcast %cst_16 : f32 to vector<8x128xf32>
    %31 = arith.addf %30, %29 : vector<8x128xf32>
    %32 = arith.divf %30, %31 : vector<8x128xf32>
    %33 = arith.mulf %24, %6 : vector<8x128xf32>
    %34 = arith.mulf %18, %26 : vector<8x128xf32>
    %35 = arith.addf %33, %34 : vector<8x128xf32>
    %36 = math.tanh %35 : vector<8x128xf32>
    %37 = arith.mulf %32, %36 : vector<8x128xf32>
    %c1 = arith.constant 1 : index
    %c0_17 = arith.constant 0 : index
    %c0_18 = arith.constant 0 : index
    %38 = vector.load %arg5[%c1, %c0_17, %c0_18] : memref<8x8x512xf32, #tpu.memory_space<vmem>>, vector<1x8x512xf32>
    %39 = vector.shape_cast %38 : vector<1x8x512xf32> to vector<8x512xf32>
    %40 = arith.truncf %37 : vector<8x128xf32> to vector<8x128xbf16>
    %c0_19 = arith.constant 0 : index
    %c0_20 = arith.constant 0 : index
    %41 = vector.load %arg2[%c0_19, %c0_20] : memref<128x512xbf16, #tpu.memory_space<vmem>>, vector<128x512xbf16>
    %cst_21 = arith.constant dense<0.000000e+00> : vector<8x512xf32>
    %42 = tpu.matmul %40, %41, %cst_21 {dimension_numbers = #tpu.dot_dimension_numbers<[1], [0], [0], [1], [0, 0, 1, 1], [], []>} : vector<8x128xbf16>, vector<128x512xbf16>, vector<8x512xf32> -> vector<8x512xf32>
    %43 = arith.addf %39, %42 : vector<8x512xf32>
    %44 = vector.extract_strided_slice %43 {offsets = [0, 0], sizes = [8, 128], strides = [1, 1]} : vector<8x512xf32> to vector<8x128xf32>
    %45 = arith.negf %44 : vector<8x128xf32>
    %46 = math.exp %45 : vector<8x128xf32>
    %cst_22 = arith.constant 1.000000e+00 : f32
    %47 = vector.broadcast %cst_22 : f32 to vector<8x128xf32>
    %48 = arith.addf %47, %46 : vector<8x128xf32>
    %49 = arith.divf %47, %48 : vector<8x128xf32>
    %50 = vector.extract_strided_slice %43 {offsets = [0, 128], sizes = [8, 128], strides = [1, 1]} : vector<8x512xf32> to vector<8x128xf32>
    %51 = arith.negf %50 : vector<8x128xf32>
    %52 = math.exp %51 : vector<8x128xf32>
    %cst_23 = arith.constant 1.000000e+00 : f32
    %53 = vector.broadcast %cst_23 : f32 to vector<8x128xf32>
    %54 = arith.addf %53, %52 : vector<8x128xf32>
    %55 = arith.divf %53, %54 : vector<8x128xf32>
    %56 = vector.extract_strided_slice %43 {offsets = [0, 256], sizes = [8, 128], strides = [1, 1]} : vector<8x512xf32> to vector<8x128xf32>
    %57 = math.tanh %56 : vector<8x128xf32>
    %58 = vector.extract_strided_slice %43 {offsets = [0, 384], sizes = [8, 128], strides = [1, 1]} : vector<8x512xf32> to vector<8x128xf32>
    %59 = arith.negf %58 : vector<8x128xf32>
    %60 = math.exp %59 : vector<8x128xf32>
    %cst_24 = arith.constant 1.000000e+00 : f32
    %61 = vector.broadcast %cst_24 : f32 to vector<8x128xf32>
    %62 = arith.addf %61, %60 : vector<8x128xf32>
    %63 = arith.divf %61, %62 : vector<8x128xf32>
    %64 = arith.mulf %55, %35 : vector<8x128xf32>
    %65 = arith.mulf %49, %57 : vector<8x128xf32>
    %66 = arith.addf %64, %65 : vector<8x128xf32>
    %67 = math.tanh %66 : vector<8x128xf32>
    %68 = arith.mulf %63, %67 : vector<8x128xf32>
    %c2 = arith.constant 2 : index
    %c0_25 = arith.constant 0 : index
    %c0_26 = arith.constant 0 : index
    %69 = vector.load %arg5[%c2, %c0_25, %c0_26] : memref<8x8x512xf32, #tpu.memory_space<vmem>>, vector<1x8x512xf32>
    %70 = vector.shape_cast %69 : vector<1x8x512xf32> to vector<8x512xf32>
    %71 = arith.truncf %68 : vector<8x128xf32> to vector<8x128xbf16>
    %c0_27 = arith.constant 0 : index
    %c0_28 = arith.constant 0 : index
    %72 = vector.load %arg2[%c0_27, %c0_28] : memref<128x512xbf16, #tpu.memory_space<vmem>>, vector<128x512xbf16>
    %cst_29 = arith.constant dense<0.000000e+00> : vector<8x512xf32>
    %73 = tpu.matmul %71, %72, %cst_29 {dimension_numbers = #tpu.dot_dimension_numbers<[1], [0], [0], [1], [0, 0, 1, 1], [], []>} : vector<8x128xbf16>, vector<128x512xbf16>, vector<8x512xf32> -> vector<8x512xf32>
    %74 = arith.addf %70, %73 : vector<8x512xf32>
    %75 = vector.extract_strided_slice %74 {offsets = [0, 0], sizes = [8, 128], strides = [1, 1]} : vector<8x512xf32> to vector<8x128xf32>
    %76 = arith.negf %75 : vector<8x128xf32>
    %77 = math.exp %76 : vector<8x128xf32>
    %cst_30 = arith.constant 1.000000e+00 : f32
    %78 = vector.broadcast %cst_30 : f32 to vector<8x128xf32>
    %79 = arith.addf %78, %77 : vector<8x128xf32>
    %80 = arith.divf %78, %79 : vector<8x128xf32>
    %81 = vector.extract_strided_slice %74 {offsets = [0, 128], sizes = [8, 128], strides = [1, 1]} : vector<8x512xf32> to vector<8x128xf32>
    %82 = arith.negf %81 : vector<8x128xf32>
    %83 = math.exp %82 : vector<8x128xf32>
    %cst_31 = arith.constant 1.000000e+00 : f32
    %84 = vector.broadcast %cst_31 : f32 to vector<8x128xf32>
    %85 = arith.addf %84, %83 : vector<8x128xf32>
    %86 = arith.divf %84, %85 : vector<8x128xf32>
    %87 = vector.extract_strided_slice %74 {offsets = [0, 256], sizes = [8, 128], strides = [1, 1]} : vector<8x512xf32> to vector<8x128xf32>
    %88 = math.tanh %87 : vector<8x128xf32>
    %89 = vector.extract_strided_slice %74 {offsets = [0, 384], sizes = [8, 128], strides = [1, 1]} : vector<8x512xf32> to vector<8x128xf32>
    %90 = arith.negf %89 : vector<8x128xf32>
    %91 = math.exp %90 : vector<8x128xf32>
    %cst_32 = arith.constant 1.000000e+00 : f32
    %92 = vector.broadcast %cst_32 : f32 to vector<8x128xf32>
    %93 = arith.addf %92, %91 : vector<8x128xf32>
    %94 = arith.divf %92, %93 : vector<8x128xf32>
    %95 = arith.mulf %86, %66 : vector<8x128xf32>
    %96 = arith.mulf %80, %88 : vector<8x128xf32>
    %97 = arith.addf %95, %96 : vector<8x128xf32>
    %98 = math.tanh %97 : vector<8x128xf32>
    %99 = arith.mulf %94, %98 : vector<8x128xf32>
    %c3 = arith.constant 3 : index
    %c0_33 = arith.constant 0 : index
    %c0_34 = arith.constant 0 : index
    %100 = vector.load %arg5[%c3, %c0_33, %c0_34] : memref<8x8x512xf32, #tpu.memory_space<vmem>>, vector<1x8x512xf32>
    %101 = vector.shape_cast %100 : vector<1x8x512xf32> to vector<8x512xf32>
    %102 = arith.truncf %99 : vector<8x128xf32> to vector<8x128xbf16>
    %c0_35 = arith.constant 0 : index
    %c0_36 = arith.constant 0 : index
    %103 = vector.load %arg2[%c0_35, %c0_36] : memref<128x512xbf16, #tpu.memory_space<vmem>>, vector<128x512xbf16>
    %cst_37 = arith.constant dense<0.000000e+00> : vector<8x512xf32>
    %104 = tpu.matmul %102, %103, %cst_37 {dimension_numbers = #tpu.dot_dimension_numbers<[1], [0], [0], [1], [0, 0, 1, 1], [], []>} : vector<8x128xbf16>, vector<128x512xbf16>, vector<8x512xf32> -> vector<8x512xf32>
    %105 = arith.addf %101, %104 : vector<8x512xf32>
    %106 = vector.extract_strided_slice %105 {offsets = [0, 0], sizes = [8, 128], strides = [1, 1]} : vector<8x512xf32> to vector<8x128xf32>
    %107 = arith.negf %106 : vector<8x128xf32>
    %108 = math.exp %107 : vector<8x128xf32>
    %cst_38 = arith.constant 1.000000e+00 : f32
    %109 = vector.broadcast %cst_38 : f32 to vector<8x128xf32>
    %110 = arith.addf %109, %108 : vector<8x128xf32>
    %111 = arith.divf %109, %110 : vector<8x128xf32>
    %112 = vector.extract_strided_slice %105 {offsets = [0, 128], sizes = [8, 128], strides = [1, 1]} : vector<8x512xf32> to vector<8x128xf32>
    %113 = arith.negf %112 : vector<8x128xf32>
    %114 = math.exp %113 : vector<8x128xf32>
    %cst_39 = arith.constant 1.000000e+00 : f32
    %115 = vector.broadcast %cst_39 : f32 to vector<8x128xf32>
    %116 = arith.addf %115, %114 : vector<8x128xf32>
    %117 = arith.divf %115, %116 : vector<8x128xf32>
    %118 = vector.extract_strided_slice %105 {offsets = [0, 256], sizes = [8, 128], strides = [1, 1]} : vector<8x512xf32> to vector<8x128xf32>
    %119 = math.tanh %118 : vector<8x128xf32>
    %120 = vector.extract_strided_slice %105 {offsets = [0, 384], sizes = [8, 128], strides = [1, 1]} : vector<8x512xf32> to vector<8x128xf32>
    %121 = arith.negf %120 : vector<8x128xf32>
    %122 = math.exp %121 : vector<8x128xf32>
    %cst_40 = arith.constant 1.000000e+00 : f32
    %123 = vector.broadcast %cst_40 : f32 to vector<8x128xf32>
    %124 = arith.addf %123, %122 : vector<8x128xf32>
    %125 = arith.divf %123, %124 : vector<8x128xf32>
    %126 = arith.mulf %117, %97 : vector<8x128xf32>
    %127 = arith.mulf %111, %119 : vector<8x128xf32>
    %128 = arith.addf %126, %127 : vector<8x128xf32>
    %129 = math.tanh %128 : vector<8x128xf32>
    %130 = arith.mulf %125, %129 : vector<8x128xf32>
    %c4 = arith.constant 4 : index
    %c0_41 = arith.constant 0 : index
    %c0_42 = arith.constant 0 : index
    %131 = vector.load %arg5[%c4, %c0_41, %c0_42] : memref<8x8x512xf32, #tpu.memory_space<vmem>>, vector<1x8x512xf32>
    %132 = vector.shape_cast %131 : vector<1x8x512xf32> to vector<8x512xf32>
    %133 = arith.truncf %130 : vector<8x128xf32> to vector<8x128xbf16>
    %c0_43 = arith.constant 0 : index
    %c0_44 = arith.constant 0 : index
    %134 = vector.load %arg2[%c0_43, %c0_44] : memref<128x512xbf16, #tpu.memory_space<vmem>>, vector<128x512xbf16>
    %cst_45 = arith.constant dense<0.000000e+00> : vector<8x512xf32>
    %135 = tpu.matmul %133, %134, %cst_45 {dimension_numbers = #tpu.dot_dimension_numbers<[1], [0], [0], [1], [0, 0, 1, 1], [], []>} : vector<8x128xbf16>, vector<128x512xbf16>, vector<8x512xf32> -> vector<8x512xf32>
    %136 = arith.addf %132, %135 : vector<8x512xf32>
    %137 = vector.extract_strided_slice %136 {offsets = [0, 0], sizes = [8, 128], strides = [1, 1]} : vector<8x512xf32> to vector<8x128xf32>
    %138 = arith.negf %137 : vector<8x128xf32>
    %139 = math.exp %138 : vector<8x128xf32>
    %cst_46 = arith.constant 1.000000e+00 : f32
    %140 = vector.broadcast %cst_46 : f32 to vector<8x128xf32>
    %141 = arith.addf %140, %139 : vector<8x128xf32>
    %142 = arith.divf %140, %141 : vector<8x128xf32>
    %143 = vector.extract_strided_slice %136 {offsets = [0, 128], sizes = [8, 128], strides = [1, 1]} : vector<8x512xf32> to vector<8x128xf32>
    %144 = arith.negf %143 : vector<8x128xf32>
    %145 = math.exp %144 : vector<8x128xf32>
    %cst_47 = arith.constant 1.000000e+00 : f32
    %146 = vector.broadcast %cst_47 : f32 to vector<8x128xf32>
    %147 = arith.addf %146, %145 : vector<8x128xf32>
    %148 = arith.divf %146, %147 : vector<8x128xf32>
    %149 = vector.extract_strided_slice %136 {offsets = [0, 256], sizes = [8, 128], strides = [1, 1]} : vector<8x512xf32> to vector<8x128xf32>
    %150 = math.tanh %149 : vector<8x128xf32>
    %151 = vector.extract_strided_slice %136 {offsets = [0, 384], sizes = [8, 128], strides = [1, 1]} : vector<8x512xf32> to vector<8x128xf32>
    %152 = arith.negf %151 : vector<8x128xf32>
    %153 = math.exp %152 : vector<8x128xf32>
    %cst_48 = arith.constant 1.000000e+00 : f32
    %154 = vector.broadcast %cst_48 : f32 to vector<8x128xf32>
    %155 = arith.addf %154, %153 : vector<8x128xf32>
    %156 = arith.divf %154, %155 : vector<8x128xf32>
    %157 = arith.mulf %148, %128 : vector<8x128xf32>
    %158 = arith.mulf %142, %150 : vector<8x128xf32>
    %159 = arith.addf %157, %158 : vector<8x128xf32>
    %160 = math.tanh %159 : vector<8x128xf32>
    %161 = arith.mulf %156, %160 : vector<8x128xf32>
    %c5 = arith.constant 5 : index
    %c0_49 = arith.constant 0 : index
    %c0_50 = arith.constant 0 : index
    %162 = vector.load %arg5[%c5, %c0_49, %c0_50] : memref<8x8x512xf32, #tpu.memory_space<vmem>>, vector<1x8x512xf32>
    %163 = vector.shape_cast %162 : vector<1x8x512xf32> to vector<8x512xf32>
    %164 = arith.truncf %161 : vector<8x128xf32> to vector<8x128xbf16>
    %c0_51 = arith.constant 0 : index
    %c0_52 = arith.constant 0 : index
    %165 = vector.load %arg2[%c0_51, %c0_52] : memref<128x512xbf16, #tpu.memory_space<vmem>>, vector<128x512xbf16>
    %cst_53 = arith.constant dense<0.000000e+00> : vector<8x512xf32>
    %166 = tpu.matmul %164, %165, %cst_53 {dimension_numbers = #tpu.dot_dimension_numbers<[1], [0], [0], [1], [0, 0, 1, 1], [], []>} : vector<8x128xbf16>, vector<128x512xbf16>, vector<8x512xf32> -> vector<8x512xf32>
    %167 = arith.addf %163, %166 : vector<8x512xf32>
    %168 = vector.extract_strided_slice %167 {offsets = [0, 0], sizes = [8, 128], strides = [1, 1]} : vector<8x512xf32> to vector<8x128xf32>
    %169 = arith.negf %168 : vector<8x128xf32>
    %170 = math.exp %169 : vector<8x128xf32>
    %cst_54 = arith.constant 1.000000e+00 : f32
    %171 = vector.broadcast %cst_54 : f32 to vector<8x128xf32>
    %172 = arith.addf %171, %170 : vector<8x128xf32>
    %173 = arith.divf %171, %172 : vector<8x128xf32>
    %174 = vector.extract_strided_slice %167 {offsets = [0, 128], sizes = [8, 128], strides = [1, 1]} : vector<8x512xf32> to vector<8x128xf32>
    %175 = arith.negf %174 : vector<8x128xf32>
    %176 = math.exp %175 : vector<8x128xf32>
    %cst_55 = arith.constant 1.000000e+00 : f32
    %177 = vector.broadcast %cst_55 : f32 to vector<8x128xf32>
    %178 = arith.addf %177, %176 : vector<8x128xf32>
    %179 = arith.divf %177, %178 : vector<8x128xf32>
    %180 = vector.extract_strided_slice %167 {offsets = [0, 256], sizes = [8, 128], strides = [1, 1]} : vector<8x512xf32> to vector<8x128xf32>
    %181 = math.tanh %180 : vector<8x128xf32>
    %182 = vector.extract_strided_slice %167 {offsets = [0, 384], sizes = [8, 128], strides = [1, 1]} : vector<8x512xf32> to vector<8x128xf32>
    %183 = arith.negf %182 : vector<8x128xf32>
    %184 = math.exp %183 : vector<8x128xf32>
    %cst_56 = arith.constant 1.000000e+00 : f32
    %185 = vector.broadcast %cst_56 : f32 to vector<8x128xf32>
    %186 = arith.addf %185, %184 : vector<8x128xf32>
    %187 = arith.divf %185, %186 : vector<8x128xf32>
    %188 = arith.mulf %179, %159 : vector<8x128xf32>
    %189 = arith.mulf %173, %181 : vector<8x128xf32>
    %190 = arith.addf %188, %189 : vector<8x128xf32>
    %191 = math.tanh %190 : vector<8x128xf32>
    %192 = arith.mulf %187, %191 : vector<8x128xf32>
    %c6 = arith.constant 6 : index
    %c0_57 = arith.constant 0 : index
    %c0_58 = arith.constant 0 : index
    %193 = vector.load %arg5[%c6, %c0_57, %c0_58] : memref<8x8x512xf32, #tpu.memory_space<vmem>>, vector<1x8x512xf32>
    %194 = vector.shape_cast %193 : vector<1x8x512xf32> to vector<8x512xf32>
    %195 = arith.truncf %192 : vector<8x128xf32> to vector<8x128xbf16>
    %c0_59 = arith.constant 0 : index
    %c0_60 = arith.constant 0 : index
    %196 = vector.load %arg2[%c0_59, %c0_60] : memref<128x512xbf16, #tpu.memory_space<vmem>>, vector<128x512xbf16>
    %cst_61 = arith.constant dense<0.000000e+00> : vector<8x512xf32>
    %197 = tpu.matmul %195, %196, %cst_61 {dimension_numbers = #tpu.dot_dimension_numbers<[1], [0], [0], [1], [0, 0, 1, 1], [], []>} : vector<8x128xbf16>, vector<128x512xbf16>, vector<8x512xf32> -> vector<8x512xf32>
    %198 = arith.addf %194, %197 : vector<8x512xf32>
    %199 = vector.extract_strided_slice %198 {offsets = [0, 0], sizes = [8, 128], strides = [1, 1]} : vector<8x512xf32> to vector<8x128xf32>
    %200 = arith.negf %199 : vector<8x128xf32>
    %201 = math.exp %200 : vector<8x128xf32>
    %cst_62 = arith.constant 1.000000e+00 : f32
    %202 = vector.broadcast %cst_62 : f32 to vector<8x128xf32>
    %203 = arith.addf %202, %201 : vector<8x128xf32>
    %204 = arith.divf %202, %203 : vector<8x128xf32>
    %205 = vector.extract_strided_slice %198 {offsets = [0, 128], sizes = [8, 128], strides = [1, 1]} : vector<8x512xf32> to vector<8x128xf32>
    %206 = arith.negf %205 : vector<8x128xf32>
    %207 = math.exp %206 : vector<8x128xf32>
    %cst_63 = arith.constant 1.000000e+00 : f32
    %208 = vector.broadcast %cst_63 : f32 to vector<8x128xf32>
    %209 = arith.addf %208, %207 : vector<8x128xf32>
    %210 = arith.divf %208, %209 : vector<8x128xf32>
    %211 = vector.extract_strided_slice %198 {offsets = [0, 256], sizes = [8, 128], strides = [1, 1]} : vector<8x512xf32> to vector<8x128xf32>
    %212 = math.tanh %211 : vector<8x128xf32>
    %213 = vector.extract_strided_slice %198 {offsets = [0, 384], sizes = [8, 128], strides = [1, 1]} : vector<8x512xf32> to vector<8x128xf32>
    %214 = arith.negf %213 : vector<8x128xf32>
    %215 = math.exp %214 : vector<8x128xf32>
    %cst_64 = arith.constant 1.000000e+00 : f32
    %216 = vector.broadcast %cst_64 : f32 to vector<8x128xf32>
    %217 = arith.addf %216, %215 : vector<8x128xf32>
    %218 = arith.divf %216, %217 : vector<8x128xf32>
    %219 = arith.mulf %210, %190 : vector<8x128xf32>
    %220 = arith.mulf %204, %212 : vector<8x128xf32>
    %221 = arith.addf %219, %220 : vector<8x128xf32>
    %222 = math.tanh %221 : vector<8x128xf32>
    %223 = arith.mulf %218, %222 : vector<8x128xf32>
    %c7 = arith.constant 7 : index
    %c0_65 = arith.constant 0 : index
    %c0_66 = arith.constant 0 : index
    %224 = vector.load %arg5[%c7, %c0_65, %c0_66] : memref<8x8x512xf32, #tpu.memory_space<vmem>>, vector<1x8x512xf32>
    %225 = vector.shape_cast %224 : vector<1x8x512xf32> to vector<8x512xf32>
    %226 = arith.truncf %223 : vector<8x128xf32> to vector<8x128xbf16>
    %c0_67 = arith.constant 0 : index
    %c0_68 = arith.constant 0 : index
    %227 = vector.load %arg2[%c0_67, %c0_68] : memref<128x512xbf16, #tpu.memory_space<vmem>>, vector<128x512xbf16>
    %cst_69 = arith.constant dense<0.000000e+00> : vector<8x512xf32>
    %228 = tpu.matmul %226, %227, %cst_69 {dimension_numbers = #tpu.dot_dimension_numbers<[1], [0], [0], [1], [0, 0, 1, 1], [], []>} : vector<8x128xbf16>, vector<128x512xbf16>, vector<8x512xf32> -> vector<8x512xf32>
    %229 = arith.addf %225, %228 : vector<8x512xf32>
    %230 = vector.extract_strided_slice %229 {offsets = [0, 0], sizes = [8, 128], strides = [1, 1]} : vector<8x512xf32> to vector<8x128xf32>
    %231 = arith.negf %230 : vector<8x128xf32>
    %232 = math.exp %231 : vector<8x128xf32>
    %cst_70 = arith.constant 1.000000e+00 : f32
    %233 = vector.broadcast %cst_70 : f32 to vector<8x128xf32>
    %234 = arith.addf %233, %232 : vector<8x128xf32>
    %235 = arith.divf %233, %234 : vector<8x128xf32>
    %236 = vector.extract_strided_slice %229 {offsets = [0, 128], sizes = [8, 128], strides = [1, 1]} : vector<8x512xf32> to vector<8x128xf32>
    %237 = arith.negf %236 : vector<8x128xf32>
    %238 = math.exp %237 : vector<8x128xf32>
    %cst_71 = arith.constant 1.000000e+00 : f32
    %239 = vector.broadcast %cst_71 : f32 to vector<8x128xf32>
    %240 = arith.addf %239, %238 : vector<8x128xf32>
    %241 = arith.divf %239, %240 : vector<8x128xf32>
    %242 = vector.extract_strided_slice %229 {offsets = [0, 256], sizes = [8, 128], strides = [1, 1]} : vector<8x512xf32> to vector<8x128xf32>
    %243 = math.tanh %242 : vector<8x128xf32>
    %244 = vector.extract_strided_slice %229 {offsets = [0, 384], sizes = [8, 128], strides = [1, 1]} : vector<8x512xf32> to vector<8x128xf32>
    %245 = arith.negf %244 : vector<8x128xf32>
    %246 = math.exp %245 : vector<8x128xf32>
    %cst_72 = arith.constant 1.000000e+00 : f32
    %247 = vector.broadcast %cst_72 : f32 to vector<8x128xf32>
    %248 = arith.addf %247, %246 : vector<8x128xf32>
    %249 = arith.divf %247, %248 : vector<8x128xf32>
    %250 = arith.mulf %241, %221 : vector<8x128xf32>
    %251 = arith.mulf %235, %243 : vector<8x128xf32>
    %252 = arith.addf %250, %251 : vector<8x128xf32>
    %253 = math.tanh %252 : vector<8x128xf32>
    %254 = arith.mulf %249, %253 : vector<8x128xf32>
    %c0_73 = arith.constant 0 : index
    %c0_74 = arith.constant 0 : index
    %255 = vector.load %arg3[%c0_73, %c0_74] : memref<136x128xf32, #tpu.memory_space<vmem>>, vector<128x128xf32>
    %c128 = arith.constant 128 : index
    %c0_75 = arith.constant 0 : index
    %256 = vector.load %arg3[%c128, %c0_75] : memref<136x128xf32, #tpu.memory_space<vmem>>, vector<1x128xf32>
    %cst_76 = arith.constant dense<0.000000e+00> : vector<8x128xf32>
    %257 = tpu.matmul %254, %255, %cst_76 {dimension_numbers = #tpu.dot_dimension_numbers<[1], [0], [0], [1], [0, 0, 1, 1], [], []>} : vector<8x128xf32>, vector<128x128xf32>, vector<8x128xf32> -> vector<8x128xf32>
    %258 = vector.broadcast %256 : vector<1x128xf32> to vector<8x128xf32>
    %259 = arith.addf %257, %258 : vector<8x128xf32>
    %c0_77 = arith.constant 0 : index
    %c0_78 = arith.constant 0 : index
    %260 = vector.load %arg4[%c0_77, %c0_78] : memref<8x128xf32, #tpu.memory_space<vmem>>, vector<8x128xf32>
    tpu.vector_store %arg4[%c0_77, %c0_78], %259 {strides = array<i32>} : memref<8x128xf32, #tpu.memory_space<vmem>>, vector<8x128xf32>,
    return
  }
}

</mosaic_0001>

<bundles_post_ra>
// kernel: financial_model_forward.1
= control target key start
LH: loop header
LB: loop body
LE: loop exit
PB: predicated region body
PF: predicated region fallthrough
CT: control target
= control target key end

     0   :  { %9 = vsyncpa [#allocation4], 0  ;;  %s2551_s0 = inlined_call_operand.vmem [shape: f32[64,8], index: 0, kind: input, shape index: {}]   ;;  %s2552_s1 = inlined_call_operand.vmem [shape: f32[8,512], index: 1, kind: input, shape index: {}]   ;;  %s2553_s2 = inlined_call_operand.hbm [shape: bf16[128,512], index: 2, kind: input, shape index: {}]   ;;  %s2554_s3 = inlined_call_operand.hbm [shape: f32[136,128], index: 3, kind: input, shape index: {}]   ;;  %s2555_s4 = inlined_call_operand.vmem [shape: f32[8,128], index: 4, kind: output, shape index: {}]  }
   0x1   :  { %10 = vsyncpa [#allocation6], 0  ;;  %s1972_s15 = smov [#allocation3]   ;;  %s1924_s19 = scalar_lea.hbm %s2553_s2, 4096 }
   0x2   :  { %s20_s16 = sshll.u32 %s1972_s15, 4  ;;  %p1925_p0 = scmp.ne.s32.totalorder %s2553_s2, %s1924_s19  ;;  %s21_s16 = int_to_ptr.vmem [resolvable:$true] %s20_s16 }
   0x3   :  { %p1928_p1 = scmp.lt.u32.totalorder %s1924_s19, %s2553_s2 }
   0x5   :  { %p1930_p2 = pnand %p1928_p1, %p1925_p0 }
   0x7   :  { %1933 = shalt.err (!%p1930_p2)
}
   0x8   :  { %s1934_s24 = scalar_lea.vmem %s21_s16, 4096  ;;  %p1939_p4 = scmp.lt.s32.totalorder %s21_s16, %s21_s16 }
   0x9   :  { %p1935_p3 = scmp.ne.s32.totalorder %s21_s16, %s1934_s24  ;;  %p1940_p5 = scmp.lt.s32.totalorder %s1934_s24, %s1934_s24 }
   0xb   :  { %p1941_p6 = por %p1940_p5, %p1939_p4 }
   0xd   :  { %p1942_p7 = pnand %p1941_p6, %p1935_p3 }
   0xf   :  { %1945 = shalt.err (!%p1942_p7)
}
  0x10   :  { %s1973_s25 = smov 256   ;;  %s1974_s26 = smov 16  }
  0x11   :  { %26 = dma.hbm_to_vmem [thread:$0]  %s2553_s2, 4096, %s21_s16, [#allocation4], %s1973_s25, %s1973_s25, %s1974_s26  }
  0x12   :  { %s1975_s29 = smov [#allocation5]   ;;  %s1946_s7 = scalar_lea.hbm %s2554_s3, 2176 }
  0x13   :  { %s32_s30 = sshll.u32 %s1975_s29, 4  ;;  %p1947_p8 = scmp.ne.s32.totalorder %s2554_s3, %s1946_s7  ;;  %s33_s30 = int_to_ptr.vmem [resolvable:$true] %s32_s30 }
  0x14   :  { %p1950_p9 = scmp.lt.u32.totalorder %s1946_s7, %s2554_s3 }
  0x16   :  { %p1952_p10 = pnand %p1950_p9, %p1947_p8 }
  0x18   :  { %1955 = shalt.err (!%p1952_p10)
}
  0x19   :  { %s1956_s12 = scalar_lea.vmem %s33_s30, 2176  ;;  %p1961_p12 = scmp.lt.s32.totalorder %s33_s30, %s33_s30 }
  0x1a   :  { %p1957_p11 = scmp.ne.s32.totalorder %s33_s30, %s1956_s12  ;;  %p1962_p13 = scmp.lt.s32.totalorder %s1956_s12, %s1956_s12 }
  0x1c   :  { %p1963_p0 = por %p1962_p13, %p1961_p12 }
  0x1e   :  { %p1964_p1 = pnand %p1963_p0, %p1957_p11 }
  0x20   :  { %1967 = shalt.err (!%p1964_p1)
}
  0x21   :  { %s1976_s2 = smov 128   ;;  %s1977_s13 = smov 8  }
  0x22   :  { %38 = dma.hbm_to_vmem [thread:$0]  %s2554_s3, 2176, %s33_s30, [#allocation6], %s1976_s2, %s1976_s2, %s1977_s13  }
  0x23   :  { %1968 = dma.done.wait [#allocation4], 4096  }
  0x24   :  { %1969 = vsyncadd [#allocation4], 4294963200 }
  0x25   :  { %1970 = dma.done.wait [#allocation6], 2176  }
  0x26   :  { %1971 = vsyncadd [#allocation6], 4294965120  ;;  %v2556_v0 = vmov 0.0   ;;  %v55_v1 = vld [vmem:[%s2552_s1 + $0x8] sm:$0xff]  ;;  %v57_v2 = vld [vmem:[%s2552_s1 + $0x18] sm:$0xff]  ;;  %vm58_vm0 = vcmask 64512  }
  0x27   :  { %147 = vmatprep.mubr.f32.mxu0 %v2556_v0  ;;  %260 = vmatprep.mubr.f32.mxu1 %v2556_v0  ;;  %v54_v3 = vld [vmem:[%s2552_s1] sm:$0xff]  ;;  %v56_v4 = vld [vmem:[%s2552_s1 + $0x10] sm:$0xff]  ;;  %v2052_v7 = vld [vmem:[#allocation3 + $0xc] ss:$16 sps:$4 sm:$0xff]   ;;  %v2557_v45 = vmov 0   ;;  %vm1981_vm1 = vmmov 0  }
  0x28   :  { %83 = vmatprep.subr.mxu0 %v55_v1  ;;  %196 = vmatprep.subr.mxu1 %v57_v2  ;;  %v46_v5 = vld [vmem:[%s2551_s0] sm:$0xff]  ;;  %v2057_v9 = vld [vmem:[#allocation3 + $0x8] ss:$16 sps:$4 sm:$0xff]   ;;  %v2069_v12 = vld [vmem:[#allocation3 + $0x2c] ss:$16 sps:$4 sm:$0xff]  }
  0x29   :  { %84 = vmatpush1.msra.mxu0 %v54_v3  ;;  %197 = vmatpush1.msra.mxu1 %v56_v4  ;;  %v2048_v6 = vld [vmem:[#allocation3 + $0x4] ss:$16 sps:$4 sm:$0xff]   ;;  %v2054_v8 = vld [vmem:[#allocation3] ss:$16 sps:$4 sm:$0xff]   ;;  %v47_v10 = vld [vmem:[%s2551_s0 + $0x8] sm:$0xff] }
  0x2a   :  { %1557 = vmatmul.mubr.msk.f32.vlgmr.msra.gmra.mrb[0].mxu0 %vm58_vm0, %v46_v5  ;;  %1565 = vmatmul.mubr.msk.f32.vlgmr.msra.gmra.mrb[0].mxu1 %vm58_vm0, %v46_v5  ;;  %v2065_v11 = vld [vmem:[#allocation3 + $0x24] ss:$16 sps:$4 sm:$0xff]   ;;  %v2071_v13 = vld [vmem:[#allocation3 + $0x20] ss:$16 sps:$4 sm:$0xff]   ;;  %v2075_v14 = vld [vmem:[#allocation3 + $0x28] ss:$16 sps:$4 sm:$0xff]  }
  0x2b   :  { %537 = vmatprep.subr.bf16.mxu0 %v2048_v6  ;;  %153 = vmatprep.mubr.f32.mxu0 %v2556_v0  ;;  %v48_v15 = vld [vmem:[%s2551_s0 + $0x10] sm:$0xff]  ;;  %v2086_v17 = vld [vmem:[#allocation3 + $0x4c] ss:$16 sps:$4 sm:$0xff]   ;;  %v2092_v19 = vld [vmem:[#allocation3 + $0x48] ss:$16 sps:$4 sm:$0xff]  }
  0x2c   :  { %578 = vmatprep.subr.bf16.mxu1 %v2052_v7  ;;  %538 = vmatpush1.bf16.msra.mxu0 %v2054_v8  ;;  %v2082_v16 = vld [vmem:[#allocation3 + $0x44] ss:$16 sps:$4 sm:$0xff]   ;;  %v2088_v18 = vld [vmem:[#allocation3 + $0x40] ss:$16 sps:$4 sm:$0xff]   ;;  %v49_v20 = vld [vmem:[%s2551_s0 + $0x18] sm:$0xff] }
  0x2d   :  { %579 = vmatpush1.bf16.msra.mxu1 %v2057_v9  ;;  %266 = vmatprep.mubr.f32.mxu1 %v2556_v0  ;;  %v2101_v21 = vld [vmem:[#allocation3 + $0x64] ss:$16 sps:$4 sm:$0xff]   ;;  %v2103_v22 = vld [vmem:[#allocation3 + $0x6c] ss:$16 sps:$4 sm:$0xff]   ;;  %v2107_v23 = vld [vmem:[#allocation3 + $0x60] ss:$16 sps:$4 sm:$0xff]  }
  0x2e   :  { %1558 = vmatmul.mubr.msk.f32.gmra.mrb[2].mxu0 %vm58_vm0, %v47_v10  ;;  %1566 = vmatmul.mubr.msk.f32.gmra.mrb[2].mxu1 %vm58_vm0, %v47_v10  ;;  %v2111_v24 = vld [vmem:[#allocation3 + $0x68] ss:$16 sps:$4 sm:$0xff]   ;;  %v50_v25 = vld [vmem:[%s2551_s0 + $0x20] sm:$0xff]  ;;  %v2122_v27 = vld [vmem:[#allocation3 + $0x8c] ss:$16 sps:$4 sm:$0xff]  }
  0x2f   :  { %539 = vmatprep.subr.bf16.mxu0 %v2065_v11  ;;  %580 = vmatprep.subr.bf16.mxu1 %v2069_v12  ;;  %v2120_v26 = vld [vmem:[#allocation3 + $0x84] ss:$16 sps:$4 sm:$0xff]   ;;  %v2126_v28 = vld [vmem:[#allocation3 + $0x80] ss:$16 sps:$4 sm:$0xff]   ;;  %v2130_v29 = vld [vmem:[#allocation3 + $0x88] ss:$16 sps:$4 sm:$0xff]  }
  0x30   :  { %540 = vmatpush1.bf16.msra.mxu0 %v2071_v13  ;;  %159 = vmatprep.mubr.f32.mxu0 %v2556_v0  ;;  %v51_v30 = vld [vmem:[%s2551_s0 + $0x28] sm:$0xff]  ;;  %v2137_v31 = vld [vmem:[#allocation3 + $0xa4] ss:$16 sps:$4 sm:$0xff]   ;;  %v2145_v33 = vld [vmem:[#allocation3 + $0xa0] ss:$16 sps:$4 sm:$0xff]  }
  0x31   :  { %581 = vmatpush1.bf16.msra.mxu1 %v2075_v14  ;;  %272 = vmatprep.mubr.f32.mxu1 %v2556_v0  ;;  %v2141_v32 = vld [vmem:[#allocation3 + $0xac] ss:$16 sps:$4 sm:$0xff]   ;;  %v2149_v34 = vld [vmem:[#allocation3 + $0xa8] ss:$16 sps:$4 sm:$0xff]   ;;  %v52_v35 = vld [vmem:[%s2551_s0 + $0x30] sm:$0xff] }
  0x32   :  { %1559 = vmatmul.mubr.msk.f32.gmra.mrb[4].mxu0 %vm58_vm0, %v48_v15  ;;  %1567 = vmatmul.mubr.msk.f32.gmra.mrb[4].mxu1 %vm58_vm0, %v48_v15  ;;  %v2158_v36 = vld [vmem:[#allocation3 + $0xc4] ss:$16 sps:$4 sm:$0xff]   ;;  %v2160_v37 = vld [vmem:[#allocation3 + $0xcc] ss:$16 sps:$4 sm:$0xff]   ;;  %v2164_v38 = vld [vmem:[#allocation3 + $0xc0] ss:$16 sps:$4 sm:$0xff]  }
  0x33   :  { %541 = vmatprep.subr.bf16.mxu0 %v2082_v16  ;;  %582 = vmatprep.subr.bf16.mxu1 %v2086_v17  ;;  %v2168_v39 = vld [vmem:[#allocation3 + $0xc8] ss:$16 sps:$4 sm:$0xff]   ;;  %v2177_v41 = vld [vmem:[#allocation3 + $0xe4] ss:$16 sps:$4 sm:$0xff]   ;;  %v2179_v42 = vld [vmem:[#allocation3 + $0xec] ss:$16 sps:$4 sm:$0xff]  }
  0x34   :  { %542 = vmatpush1.bf16.msra.mxu0 %v2088_v18  ;;  %165 = vmatprep.mubr.f32.mxu0 %v2556_v0  ;;  %v53_v40 = vld [vmem:[%s2551_s0 + $0x38] sm:$0xff]  ;;  %v2183_v43 = vld [vmem:[#allocation3 + $0xe0] ss:$16 sps:$4 sm:$0xff]  }
  0x35   :  { %583 = vmatpush1.bf16.msra.mxu1 %v2092_v19  ;;  %278 = vmatprep.mubr.f32.mxu1 %v2556_v0  ;;  %v2187_v44 = vld [vmem:[#allocation3 + $0xe8] ss:$16 sps:$4 sm:$0xff]  }
  0x36   :  { %1560 = vmatmul.mubr.msk.f32.gmra.mrb[6].mxu0 %vm58_vm0, %v49_v20  ;;  %1568 = vmatmul.mubr.msk.f32.gmra.mrb[6].mxu1 %vm58_vm0, %v49_v20 }
  0x37   :  { %543 = vmatprep.subr.bf16.mxu0 %v2101_v21  ;;  %584 = vmatprep.subr.bf16.mxu1 %v2103_v22 }
  0x38   :  { %544 = vmatpush1.bf16.msra.mxu0 %v2107_v23  ;;  %171 = vmatprep.mubr.f32.mxu0 %v2556_v0 }
  0x39   :  { %585 = vmatpush1.bf16.msra.mxu1 %v2111_v24  ;;  %284 = vmatprep.mubr.f32.mxu1 %v2556_v0 }
  0x3a   :  { %1561 = vmatmul.mubr.msk.f32.gmra.mrb[8].mxu0 %vm58_vm0, %v50_v25  ;;  %1569 = vmatmul.mubr.msk.f32.gmra.mrb[8].mxu1 %vm58_vm0, %v50_v25 }
  0x3b   :  { %545 = vmatprep.subr.bf16.mxu0 %v2120_v26  ;;  %586 = vmatprep.subr.bf16.mxu1 %v2122_v27 }
  0x3c   :  { %546 = vmatpush1.bf16.msra.mxu0 %v2126_v28  ;;  %177 = vmatprep.mubr.f32.mxu0 %v2556_v0 }
  0x3d   :  { %587 = vmatpush1.bf16.msra.mxu1 %v2130_v29  ;;  %290 = vmatprep.mubr.f32.mxu1 %v2556_v0 }
  0x3e   :  { %1562 = vmatmul.mubr.msk.f32.gmra.mrb[10].mxu0 %vm58_vm0, %v51_v30  ;;  %1570 = vmatmul.mubr.msk.f32.gmra.mrb[10].mxu1 %vm58_vm0, %v51_v30 }
  0x3f   :  { %547 = vmatprep.subr.bf16.mxu0 %v2137_v31  ;;  %588 = vmatprep.subr.bf16.mxu1 %v2141_v32 }
  0x40   :  { %548 = vmatpush1.bf16.msra.mxu0 %v2145_v33  ;;  %183 = vmatprep.mubr.f32.mxu0 %v2556_v0 }
  0x41   :  { %589 = vmatpush1.bf16.msra.mxu1 %v2149_v34  ;;  %296 = vmatprep.mubr.f32.mxu1 %v2556_v0 }
  0x42   :  { %1563 = vmatmul.mubr.msk.f32.gmra.mrb[12].mxu0 %vm58_vm0, %v52_v35  ;;  %1571 = vmatmul.mubr.msk.f32.gmra.mrb[12].mxu1 %vm58_vm0, %v52_v35 }
  0x43   :  { %549 = vmatprep.subr.bf16.mxu0 %v2158_v36  ;;  %590 = vmatprep.subr.bf16.mxu1 %v2160_v37 }
  0x44   :  { %550 = vmatpush1.bf16.msra.mxu0 %v2164_v38  ;;  %189 = vmatprep.mubr.f32.mxu0 %v2556_v0 }
  0x45   :  { %591 = vmatpush1.bf16.msra.mxu1 %v2168_v39  ;;  %302 = vmatprep.mubr.f32.mxu1 %v2556_v0 }
  0x46   :  { %1564 = vmatmul.mubr.msk.f32.gmra.mrb[14].mxu0 %vm58_vm0, %v53_v40  ;;  %1572 = vmatmul.mubr.msk.f32.gmra.mrb[14].mxu1 %vm58_vm0, %v53_v40 }
  0x47   :  { %551 = vmatprep.subr.bf16.mxu0 %v2177_v41  ;;  %592 = vmatprep.subr.bf16.mxu1 %v2179_v42 }
  0x48   :  { %552 = vmatpush1.bf16.msra.mxu0 %v2183_v43  ;;  %569 = vmatprep.mubr.bf16.mxu0 %v2557_v45 }
  0x49   :  { %593 = vmatpush1.bf16.msra.mxu1 %v2187_v44  ;;  %610 = vmatprep.mubr.bf16.mxu1 %v2557_v45 }
  0x4a   :  { %653 = vmatprep.subr.bf16.mxu0 %v2048_v6  ;;  %694 = vmatprep.subr.bf16.mxu1 %v2052_v7 }
  0x4b   :  { %570 = vmatmul.mubr.bf16.vlgmr.msra.gmra.mrb[16].mxu0 %v2557_v45 }
  0x4c   :  { %611 = vmatmul.mubr.bf16.vlgmr.msra.gmra.mrb[16].mxu1 %v2557_v45  ;;  %654 = vmatpush1.bf16.msra.mxu0 %v2054_v8 }
  0x4d   :  { %695 = vmatpush1.bf16.msra.mxu1 %v2057_v9  ;;  %655 = vmatprep.subr.bf16.mxu0 %v2065_v11 }
  0x4e   :  { %696 = vmatprep.subr.bf16.mxu1 %v2069_v12  ;;  %685 = vmatprep.mubr.bf16.mxu0 %v2557_v45 }
  0x4f   :  { %726 = vmatprep.mubr.bf16.mxu1 %v2557_v45 }
  0x50   :  { %656 = vmatpush1.bf16.msra.mxu0 %v2071_v13 }
  0x51   :  { %697 = vmatpush1.bf16.msra.mxu1 %v2075_v14  ;;  %657 = vmatprep.subr.bf16.mxu0 %v2082_v16 }
  0x52   :  { %698 = vmatprep.subr.bf16.mxu1 %v2086_v17 }
  0x54   :  { %658 = vmatpush1.bf16.msra.mxu0 %v2088_v18 }
  0x55   :  { %699 = vmatpush1.bf16.msra.mxu1 %v2092_v19  ;;  %659 = vmatprep.subr.bf16.mxu0 %v2101_v21 }
  0x56   :  { %700 = vmatprep.subr.bf16.mxu1 %v2103_v22 }
  0x58   :  { %660 = vmatpush1.bf16.msra.mxu0 %v2107_v23 }
  0x59   :  { %701 = vmatpush1.bf16.msra.mxu1 %v2111_v24  ;;  %661 = vmatprep.subr.bf16.mxu0 %v2120_v26 }
  0x5a   :  { %702 = vmatprep.subr.bf16.mxu1 %v2122_v27 }
  0x5c   :  { %662 = vmatpush1.bf16.msra.mxu0 %v2126_v28 }
  0x5d   :  { %703 = vmatpush1.bf16.msra.mxu1 %v2130_v29  ;;  %663 = vmatprep.subr.bf16.mxu0 %v2137_v31 }
  0x5e   :  { %704 = vmatprep.subr.bf16.mxu1 %v2141_v32 }
  0x60   :  { %664 = vmatpush1.bf16.msra.mxu0 %v2145_v33 }
  0x61   :  { %705 = vmatpush1.bf16.msra.mxu1 %v2149_v34  ;;  %665 = vmatprep.subr.bf16.mxu0 %v2158_v36 }
  0x62   :  { %706 = vmatprep.subr.bf16.mxu1 %v2160_v37 }
  0x64   :  { %666 = vmatpush1.bf16.msra.mxu0 %v2164_v38 }
  0x65   :  { %707 = vmatpush1.bf16.msra.mxu1 %v2168_v39  ;;  %667 = vmatprep.subr.bf16.mxu0 %v2177_v41 }
  0x66   :  { %708 = vmatprep.subr.bf16.mxu1 %v2179_v42 }
  0x68   :  { %668 = vmatpush1.bf16.msra.mxu0 %v2183_v43 }
  0x69   :  { %709 = vmatpush1.bf16.msra.mxu1 %v2187_v44  ;;  %769 = vmatprep.subr.bf16.mxu0 %v2048_v6 }
  0x6a   :  { %810 = vmatprep.subr.bf16.mxu1 %v2052_v7 }
  0xfd   :  { %v149_v46 = vpop.f32.mrb[0].mxu0  ;;  %v262_v47 = vpop.f32.mrb[0].mxu1 }
  0xfe   :  { %v151_v48 = vpop.f32.mrb[1].mxu0  ;;  %v264_v49 = vpop.f32.mrb[1].mxu1 }
 0x101   :  { %v2235_v50 = vpop.f32.mrb[2].mxu0  ;;  %v2237_v51 = vpop.f32.mrb[2].mxu1 }
 0x102   :  { %v2239_v52 = vpop.f32.mrb[3].mxu0  ;;  %v2241_v53 = vpop.f32.mrb[3].mxu1 }
 0x105   :  { %v2243_v54 = vpop.f32.mrb[4].mxu0  ;;  %v2245_v55 = vpop.f32.mrb[4].mxu1 }
 0x106   :  { %v2247_v56 = vpop.f32.mrb[5].mxu0  ;;  %v2249_v57 = vpop.f32.mrb[5].mxu1 }
 0x109   :  { %v2251_v58 = vpop.f32.mrb[6].mxu0  ;;  %v2253_v59 = vpop.f32.mrb[6].mxu1 }
 0x10a   :  { %v2255_v60 = vpop.f32.mrb[7].mxu0  ;;  %v2257_v61 = vpop.f32.mrb[7].mxu1 }
 0x10b   :  { %2559 = vst [vmem:[#allocation9_spill] sm:$0xff] %v2255_v60  ;;  %2560 = vst [vmem:[#allocation10_spill] sm:$0xff] %v2257_v61 }
 0x10d   :  { %v2259_v62 = vpop.f32.mrb[8].mxu0  ;;  %v2261_v63 = vpop.f32.mrb[8].mxu1 }
 0x10e   :  { %2561 = vst [vmem:[#allocation11_spill] sm:$0xff] %v2259_v62  ;;  %2562 = vst [vmem:[#allocation12_spill] sm:$0xff] %v2261_v63  ;;  %v2263_v1 = vpop.f32.mrb[9].mxu0  ;;  %v2265_v2 = vpop.f32.mrb[9].mxu1 }
 0x10f   :  { %2563 = vst [vmem:[#allocation13_spill] sm:$0xff] %v2263_v1  ;;  %2564 = vst [vmem:[#allocation14_spill] sm:$0xff] %v2265_v2 }
 0x111   :  { %v2267_v3 = vpop.f32.mrb[10].mxu0  ;;  %v2269_v4 = vpop.f32.mrb[10].mxu1 }
 0x112   :  { %2565 = vst [vmem:[#allocation15_spill] sm:$0xff] %v2267_v3  ;;  %2566 = vst [vmem:[#allocation16_spill] sm:$0xff] %v2269_v4  ;;  %v2271_v5 = vpop.f32.mrb[11].mxu0  ;;  %v2273_v10 = vpop.f32.mrb[11].mxu1 }
 0x113   :  { %2567 = vst [vmem:[#allocation17_spill] sm:$0xff] %v2271_v5  ;;  %2568 = vst [vmem:[#allocation18_spill] sm:$0xff] %v2273_v10 }
 0x115   :  { %v2275_v15 = vpop.f32.mrb[12].mxu0  ;;  %v2277_v20 = vpop.f32.mrb[12].mxu1 }
 0x116   :  { %2569 = vst [vmem:[#allocation19_spill] sm:$0xff] %v2275_v15  ;;  %2570 = vst [vmem:[#allocation20_spill] sm:$0xff] %v2277_v20  ;;  %v2279_v25 = vpop.f32.mrb[13].mxu0  ;;  %v2281_v30 = vpop.f32.mrb[13].mxu1 }
 0x117   :  { %2571 = vst [vmem:[#allocation21_spill] sm:$0xff] %v2279_v25  ;;  %2572 = vst [vmem:[#allocation22_spill] sm:$0xff] %v2281_v30 }
 0x119   :  { %v2283_v35 = vpop.f32.mrb[14].mxu0  ;;  %v2285_v40 = vpop.f32.mrb[14].mxu1 }
 0x11a   :  { %2573 = vst [vmem:[#allocation23_spill] sm:$0xff] %v2283_v35  ;;  %2574 = vst [vmem:[#allocation24_spill] sm:$0xff] %v2285_v40  ;;  %v2287_v0 = vpop.f32.mrb[15].mxu0  ;;  %v2289_v45 = vpop.f32.mrb[15].mxu1 }
 0x11b   :  { %2575 = vst [vmem:[#allocation25_spill] sm:$0xff] %v2287_v0  ;;  %2576 = vst [vmem:[#allocation26_spill] sm:$0xff] %v2289_v45 }
 0x11e   :  { %v571_v4 = vpop.f32.mrb[16].mxu0 }
 0x11f   :  { %v619_v5 = vadd.f32 %v571_v4, %v149_v46  ;;  %v612_v3 = vpop.f32.mrb[16].mxu1  ;;  %v573_v10 = vpop.f32.mrb[17].mxu0 }
 0x120   :  { %v621_v2 = vadd.f32 %v612_v3, %v262_v47  ;;  %v620_v15 = vadd.f32 %v573_v10, %v151_v48  ;;  %v614_v1 = vpop.f32.mrb[17].mxu1  ;;  %v575_v20 = vpop.f32.mrb[18].mxu0 }
 0x121   :  { %v1605_v63 = vmul.f32 -1.442695, %v619_v5  ;;  %v622_v25 = vadd.f32 %v614_v1, %v264_v49  ;;  %v576_v62 = vpop.f32.mrb[19].mxu0  ;;  %v616_v30 = vpop.f32.mrb[18].mxu1 }
 0x122   :  { %v1606_v61 = vmul.f32 -1.442695, %v620_v15  ;;  %v617_v35 = vpop.f32.mrb[19].mxu1 }
 0x123   :  { %1764 = vpow2.f32 %v1605_v63  ;;  %v1607_v40 = vmul.f32 -1.442695, %v622_v25 }
 0x124   :  { %1766 = vpow2.f32 %v1606_v61 }
 0x125   :  { %1768 = vpow2.f32 %v1607_v40 }
 0x126   :  { %1770 = vtanh.f32 %v621_v2 }
 0x12d   :  { %v1765_v0 = vpop.eup %1764 }
 0x12e   :  { %v1767_v60 = vpop.eup %1766  ;;  %v626_v45 = vadd.f32 1.0, %v1765_v0 }
 0x12f   :  { %v632_v46 = vadd.f32 1.0, %v1767_v60  ;;  %v1769_v47 = vpop.eup %1768 }
 0x130   :  { %1772 = vrcp.f32 %v626_v45  ;;  %v1771_v48 = vpop.eup %1770  ;;  %v639_v62 = vadd.f32 1.0, %v1769_v47  ;;  %v2577_v45 = vmov 0  }
 0x131   :  { %1774 = vrcp.f32 %v632_v46 }
 0x132   :  { %1776 = vrcp.f32 %v639_v62 }
 0x13a   :  { %v1773_v3 = vpop.eup %1772 }
 0x13b   :  { %v1775_v4 = vpop.eup %1774  ;;  %v643_v49 = vmul.f32 %v1773_v3, %v1771_v48 }
 0x13c   :  { %v642_v1 = vmul.f32 0.0, %v1775_v4  ;;  %v1777_v61 = vpop.eup %1776 }
 0x13e   :  { %v2291_v5 = vadd.f32 %v643_v49, %v642_v1 }
 0x140   :  { %1778 = vtanh.f32 %v2291_v5 }
 0x14a   :  { %v1779_v63 = vpop.eup %1778 }
 0x14b   :  { %v646_v0 = vmul.f32 %v1779_v63, %v1777_v61 }
 0x14d   :  { %v652_v10 = vpack.c.bf16 %v646_v0, %v646_v0 }
 0x14f   :  { %686 = vmatmul.mubr.bf16.vlgmr.msra.gmra.mrb[20].mxu0 %v652_v10  ;;  %727 = vmatmul.mubr.bf16.vlgmr.msra.gmra.mrb[20].mxu1 %v652_v10 }
 0x150   :  { %770 = vmatpush1.bf16.msra.mxu0 %v2054_v8  ;;  %811 = vmatpush1.bf16.msra.mxu1 %v2057_v9 }
 0x151   :  { %771 = vmatprep.subr.bf16.mxu0 %v2065_v11  ;;  %812 = vmatprep.subr.bf16.mxu1 %v2069_v12 }
 0x152   :  { %801 = vmatprep.mubr.bf16.mxu0 %v2577_v45  ;;  %842 = vmatprep.mubr.bf16.mxu1 %v2577_v45 }
 0x154   :  { %772 = vmatpush1.bf16.msra.mxu0 %v2071_v13  ;;  %813 = vmatpush1.bf16.msra.mxu1 %v2075_v14 }
 0x155   :  { %773 = vmatprep.subr.bf16.mxu0 %v2082_v16  ;;  %814 = vmatprep.subr.bf16.mxu1 %v2086_v17 }
 0x158   :  { %774 = vmatpush1.bf16.msra.mxu0 %v2088_v18  ;;  %815 = vmatpush1.bf16.msra.mxu1 %v2092_v19 }
 0x159   :  { %775 = vmatprep.subr.bf16.mxu0 %v2101_v21  ;;  %816 = vmatprep.subr.bf16.mxu1 %v2103_v22 }
 0x15c   :  { %776 = vmatpush1.bf16.msra.mxu0 %v2107_v23  ;;  %817 = vmatpush1.bf16.msra.mxu1 %v2111_v24 }
 0x15d   :  { %777 = vmatprep.subr.bf16.mxu0 %v2120_v26  ;;  %818 = vmatprep.subr.bf16.mxu1 %v2122_v27 }
 0x160   :  { %778 = vmatpush1.bf16.msra.mxu0 %v2126_v28  ;;  %819 = vmatpush1.bf16.msra.mxu1 %v2130_v29 }
 0x161   :  { %779 = vmatprep.subr.bf16.mxu0 %v2137_v31  ;;  %820 = vmatprep.subr.bf16.mxu1 %v2141_v32 }
 0x164   :  { %780 = vmatpush1.bf16.msra.mxu0 %v2145_v33  ;;  %821 = vmatpush1.bf16.msra.mxu1 %v2149_v34 }
 0x165   :  { %781 = vmatprep.subr.bf16.mxu0 %v2158_v36  ;;  %822 = vmatprep.subr.bf16.mxu1 %v2160_v37 }
 0x168   :  { %782 = vmatpush1.bf16.msra.mxu0 %v2164_v38  ;;  %823 = vmatpush1.bf16.msra.mxu1 %v2168_v39 }
 0x169   :  { %783 = vmatprep.subr.bf16.mxu0 %v2177_v41  ;;  %824 = vmatprep.subr.bf16.mxu1 %v2179_v42 }
 0x16c   :  { %784 = vmatpush1.bf16.msra.mxu0 %v2183_v43  ;;  %825 = vmatpush1.bf16.msra.mxu1 %v2187_v44 }
 0x16d   :  { %885 = vmatprep.subr.bf16.mxu0 %v2048_v6  ;;  %926 = vmatprep.subr.bf16.mxu1 %v2052_v7 }
 0x222   :  { %v687_v60 = vpop.f32.mrb[20].mxu0  ;;  %v728_v2 = vpop.f32.mrb[20].mxu1 }
 0x223   :  { %v735_v15 = vadd.f32 %v687_v60, %v2235_v50  ;;  %v737_v20 = vadd.f32 %v728_v2, %v2237_v51  ;;  %v689_v25 = vpop.f32.mrb[21].mxu0  ;;  %v730_v30 = vpop.f32.mrb[21].mxu1 }
 0x224   :  { %v736_v35 = vadd.f32 %v689_v25, %v2239_v52  ;;  %v738_v40 = vadd.f32 %v730_v30, %v2241_v53  ;;  %v691_v46 = vpop.f32.mrb[22].mxu0  ;;  %v732_v47 = vpop.f32.mrb[22].mxu1 }
 0x225   :  { %v1608_v48 = vmul.f32 -1.442695, %v735_v15  ;;  %v692_v3 = vpop.f32.mrb[23].mxu0  ;;  %v733_v4 = vpop.f32.mrb[23].mxu1 }
 0x226   :  { %v1609_v49 = vmul.f32 -1.442695, %v736_v35  ;;  %v1610_v62 = vmul.f32 -1.442695, %v738_v40 }
 0x227   :  { %1780 = vpow2.f32 %v1608_v48 }
 0x228   :  { %1782 = vpow2.f32 %v1609_v49 }
 0x229   :  { %1784 = vpow2.f32 %v1610_v62 }
 0x22a   :  { %1786 = vtanh.f32 %v737_v20 }
 0x231   :  { %v1781_v1 = vpop.eup %1780 }
 0x232   :  { %v1783_v61 = vpop.eup %1782  ;;  %v742_v50 = vadd.f32 1.0, %v1781_v1 }
 0x233   :  { %v748_v51 = vadd.f32 1.0, %v1783_v61  ;;  %v1785_v52 = vpop.eup %1784 }
 0x234   :  { %1788 = vrcp.f32 %v742_v50  ;;  %v1787_v63 = vpop.eup %1786  ;;  %v755_v60 = vadd.f32 1.0, %v1785_v52 }
 0x235   :  { %1790 = vrcp.f32 %v748_v51 }
 0x236   :  { %1792 = vrcp.f32 %v755_v60 }
 0x23e   :  { %v1789_v53 = vpop.eup %1788 }
 0x23f   :  { %v1791_v0 = vpop.eup %1790  ;;  %v759_v10 = vmul.f32 %v1789_v53, %v1787_v63 }
 0x240   :  { %v758_v2 = vmul.f32 %v1791_v0, %v2291_v5  ;;  %v1793_v25 = vpop.eup %1792 }
 0x242   :  { %v2333_v15 = vadd.f32 %v759_v10, %v758_v2 }
 0x244   :  { %1794 = vtanh.f32 %v2333_v15 }
 0x24e   :  { %v1795_v30 = vpop.eup %1794 }
 0x24f   :  { %v762_v35 = vmul.f32 %v1795_v30, %v1793_v25 }
 0x251   :  { %v768_v20 = vpack.c.bf16 %v762_v35, %v762_v35 }
 0x253   :  { %802 = vmatmul.mubr.bf16.vlgmr.msra.gmra.mrb[24].mxu0 %v768_v20  ;;  %843 = vmatmul.mubr.bf16.vlgmr.msra.gmra.mrb[24].mxu1 %v768_v20 }
 0x254   :  { %886 = vmatpush1.bf16.msra.mxu0 %v2054_v8  ;;  %927 = vmatpush1.bf16.msra.mxu1 %v2057_v9 }
 0x255   :  { %887 = vmatprep.subr.bf16.mxu0 %v2065_v11  ;;  %928 = vmatprep.subr.bf16.mxu1 %v2069_v12 }
 0x256   :  { %917 = vmatprep.mubr.bf16.mxu0 %v2577_v45  ;;  %958 = vmatprep.mubr.bf16.mxu1 %v2577_v45 }
 0x258   :  { %888 = vmatpush1.bf16.msra.mxu0 %v2071_v13  ;;  %929 = vmatpush1.bf16.msra.mxu1 %v2075_v14 }
 0x259   :  { %889 = vmatprep.subr.bf16.mxu0 %v2082_v16  ;;  %930 = vmatprep.subr.bf16.mxu1 %v2086_v17 }
 0x25c   :  { %890 = vmatpush1.bf16.msra.mxu0 %v2088_v18  ;;  %931 = vmatpush1.bf16.msra.mxu1 %v2092_v19 }
 0x25d   :  { %891 = vmatprep.subr.bf16.mxu0 %v2101_v21  ;;  %932 = vmatprep.subr.bf16.mxu1 %v2103_v22 }
 0x260   :  { %892 = vmatpush1.bf16.msra.mxu0 %v2107_v23  ;;  %933 = vmatpush1.bf16.msra.mxu1 %v2111_v24 }
 0x261   :  { %893 = vmatprep.subr.bf16.mxu0 %v2120_v26  ;;  %934 = vmatprep.subr.bf16.mxu1 %v2122_v27 }
 0x264   :  { %894 = vmatpush1.bf16.msra.mxu0 %v2126_v28  ;;  %935 = vmatpush1.bf16.msra.mxu1 %v2130_v29 }
 0x265   :  { %895 = vmatprep.subr.bf16.mxu0 %v2137_v31  ;;  %936 = vmatprep.subr.bf16.mxu1 %v2141_v32 }
 0x268   :  { %896 = vmatpush1.bf16.msra.mxu0 %v2145_v33  ;;  %937 = vmatpush1.bf16.msra.mxu1 %v2149_v34 }
 0x269   :  { %897 = vmatprep.subr.bf16.mxu0 %v2158_v36  ;;  %938 = vmatprep.subr.bf16.mxu1 %v2160_v37 }
 0x26c   :  { %898 = vmatpush1.bf16.msra.mxu0 %v2164_v38  ;;  %939 = vmatpush1.bf16.msra.mxu1 %v2168_v39 }
 0x26d   :  { %899 = vmatprep.subr.bf16.mxu0 %v2177_v41  ;;  %940 = vmatprep.subr.bf16.mxu1 %v2179_v42 }
 0x270   :  { %900 = vmatpush1.bf16.msra.mxu0 %v2183_v43  ;;  %941 = vmatpush1.bf16.msra.mxu1 %v2187_v44 }
 0x271   :  { %1001 = vmatprep.subr.bf16.mxu0 %v2048_v6  ;;  %1042 = vmatprep.subr.bf16.mxu1 %v2052_v7 }
 0x326   :  { %v803_v5 = vpop.f32.mrb[24].mxu0  ;;  %v844_v40 = vpop.f32.mrb[24].mxu1 }
 0x327   :  { %v851_v46 = vadd.f32 %v803_v5, %v2243_v54  ;;  %v853_v47 = vadd.f32 %v844_v40, %v2245_v55  ;;  %v805_v48 = vpop.f32.mrb[25].mxu0  ;;  %v846_v3 = vpop.f32.mrb[25].mxu1 }
 0x328   :  { %v852_v4 = vadd.f32 %v805_v48, %v2247_v56  ;;  %v854_v49 = vadd.f32 %v846_v3, %v2249_v57  ;;  %v807_v62 = vpop.f32.mrb[26].mxu0  ;;  %v848_v1 = vpop.f32.mrb[26].mxu1 }
 0x329   :  { %v1611_v61 = vmul.f32 -1.442695, %v851_v46  ;;  %v808_v50 = vpop.f32.mrb[27].mxu0  ;;  %v849_v51 = vpop.f32.mrb[27].mxu1  ;;  %v2578_v62 = vld [vmem:[#allocation9_spill] sm:$0xff] }
 0x32a   :  { %v1612_v52 = vmul.f32 -1.442695, %v852_v4  ;;  %v1613_v63 = vmul.f32 -1.442695, %v854_v49 }
 0x32b   :  { %1796 = vpow2.f32 %v1611_v61  ;;  %v2579_v61 = vld [vmem:[#allocation10_spill] sm:$0xff] }
 0x32c   :  { %1798 = vpow2.f32 %v1612_v52 }
 0x32d   :  { %1800 = vpow2.f32 %v1613_v63 }
 0x32e   :  { %1802 = vtanh.f32 %v853_v47 }
 0x335   :  { %v1797_v53 = vpop.eup %1796 }
 0x336   :  { %v1799_v0 = vpop.eup %1798  ;;  %v858_v54 = vadd.f32 1.0, %v1797_v53 }
 0x337   :  { %v864_v55 = vadd.f32 1.0, %v1799_v0  ;;  %v1801_v56 = vpop.eup %1800 }
 0x338   :  { %1804 = vrcp.f32 %v858_v54  ;;  %v1803_v10 = vpop.eup %1802  ;;  %v871_v25 = vadd.f32 1.0, %v1801_v56 }
 0x339   :  { %1806 = vrcp.f32 %v864_v55 }
 0x33a   :  { %1808 = vrcp.f32 %v871_v25 }
 0x342   :  { %v1805_v57 = vpop.eup %1804 }
 0x343   :  { %v1807_v60 = vpop.eup %1806  ;;  %v875_v2 = vmul.f32 %v1805_v57, %v1803_v10 }
 0x344   :  { %v874_v30 = vmul.f32 %v1807_v60, %v2333_v15  ;;  %v1809_v20 = vpop.eup %1808 }
 0x346   :  { %v2375_v35 = vadd.f32 %v875_v2, %v874_v30 }
 0x348   :  { %1810 = vtanh.f32 %v2375_v35 }
 0x352   :  { %v1811_v5 = vpop.eup %1810 }
 0x353   :  { %v878_v40 = vmul.f32 %v1811_v5, %v1809_v20 }
 0x355   :  { %v884_v46 = vpack.c.bf16 %v878_v40, %v878_v40 }
 0x357   :  { %918 = vmatmul.mubr.bf16.vlgmr.msra.gmra.mrb[28].mxu0 %v884_v46  ;;  %959 = vmatmul.mubr.bf16.vlgmr.msra.gmra.mrb[28].mxu1 %v884_v46 }
 0x358   :  { %1002 = vmatpush1.bf16.msra.mxu0 %v2054_v8  ;;  %1043 = vmatpush1.bf16.msra.mxu1 %v2057_v9 }
 0x359   :  { %1003 = vmatprep.subr.bf16.mxu0 %v2065_v11  ;;  %1044 = vmatprep.subr.bf16.mxu1 %v2069_v12 }
 0x35a   :  { %1033 = vmatprep.mubr.bf16.mxu0 %v2577_v45  ;;  %1074 = vmatprep.mubr.bf16.mxu1 %v2577_v45 }
 0x35c   :  { %1004 = vmatpush1.bf16.msra.mxu0 %v2071_v13  ;;  %1045 = vmatpush1.bf16.msra.mxu1 %v2075_v14 }
 0x35d   :  { %1005 = vmatprep.subr.bf16.mxu0 %v2082_v16  ;;  %1046 = vmatprep.subr.bf16.mxu1 %v2086_v17 }
 0x360   :  { %1006 = vmatpush1.bf16.msra.mxu0 %v2088_v18  ;;  %1047 = vmatpush1.bf16.msra.mxu1 %v2092_v19 }
 0x361   :  { %1007 = vmatprep.subr.bf16.mxu0 %v2101_v21  ;;  %1048 = vmatprep.subr.bf16.mxu1 %v2103_v22 }
 0x364   :  { %1008 = vmatpush1.bf16.msra.mxu0 %v2107_v23  ;;  %1049 = vmatpush1.bf16.msra.mxu1 %v2111_v24 }
 0x365   :  { %1009 = vmatprep.subr.bf16.mxu0 %v2120_v26  ;;  %1050 = vmatprep.subr.bf16.mxu1 %v2122_v27 }
 0x368   :  { %1010 = vmatpush1.bf16.msra.mxu0 %v2126_v28  ;;  %1051 = vmatpush1.bf16.msra.mxu1 %v2130_v29 }
 0x369   :  { %1011 = vmatprep.subr.bf16.mxu0 %v2137_v31  ;;  %1052 = vmatprep.subr.bf16.mxu1 %v2141_v32 }
 0x36c   :  { %1012 = vmatpush1.bf16.msra.mxu0 %v2145_v33  ;;  %1053 = vmatpush1.bf16.msra.mxu1 %v2149_v34 }
 0x36d   :  { %1013 = vmatprep.subr.bf16.mxu0 %v2158_v36  ;;  %1054 = vmatprep.subr.bf16.mxu1 %v2160_v37 }
 0x370   :  { %1014 = vmatpush1.bf16.msra.mxu0 %v2164_v38  ;;  %1055 = vmatpush1.bf16.msra.mxu1 %v2168_v39 }
 0x371   :  { %1015 = vmatprep.subr.bf16.mxu0 %v2177_v41  ;;  %1056 = vmatprep.subr.bf16.mxu1 %v2179_v42 }
 0x374   :  { %1016 = vmatpush1.bf16.msra.mxu0 %v2183_v43  ;;  %1057 = vmatpush1.bf16.msra.mxu1 %v2187_v44 }
 0x375   :  { %1117 = vmatprep.subr.bf16.mxu0 %v2048_v6  ;;  %1158 = vmatprep.subr.bf16.mxu1 %v2052_v7 }
 0x42a   :  { %v919_v15 = vpop.f32.mrb[28].mxu0  ;;  %v960_v47 = vpop.f32.mrb[28].mxu1 }
 0x42b   :  { %v967_v48 = vadd.f32 %v919_v15, %v2251_v58  ;;  %v969_v3 = vadd.f32 %v960_v47, %v2253_v59  ;;  %v921_v4 = vpop.f32.mrb[29].mxu0  ;;  %v962_v49 = vpop.f32.mrb[29].mxu1 }
 0x42c   :  { %v968_v1 = vadd.f32 %v921_v4, %v2578_v62  ;;  %v970_v50 = vadd.f32 %v962_v49, %v2579_v61  ;;  %v923_v51 = vpop.f32.mrb[30].mxu0  ;;  %v964_v52 = vpop.f32.mrb[30].mxu1 }
 0x42d   :  { %v1614_v63 = vmul.f32 -1.442695, %v967_v48  ;;  %v924_v53 = vpop.f32.mrb[31].mxu0  ;;  %v965_v0 = vpop.f32.mrb[31].mxu1 }
 0x42e   :  { %v1615_v54 = vmul.f32 -1.442695, %v968_v1  ;;  %v1616_v55 = vmul.f32 -1.442695, %v970_v50 }
 0x42f   :  { %1812 = vpow2.f32 %v1614_v63 }
 0x430   :  { %1814 = vpow2.f32 %v1615_v54 }
 0x431   :  { %1816 = vpow2.f32 %v1616_v55 }
 0x432   :  { %1818 = vtanh.f32 %v969_v3 }
 0x439   :  { %v1813_v56 = vpop.eup %1812 }
 0x43a   :  { %v1815_v10 = vpop.eup %1814  ;;  %v974_v58 = vadd.f32 1.0, %v1813_v56 }
 0x43b   :  { %v980_v59 = vadd.f32 1.0, %v1815_v10  ;;  %v1817_v57 = vpop.eup %1816 }
 0x43c   :  { %1820 = vrcp.f32 %v974_v58  ;;  %v1819_v60 = vpop.eup %1818  ;;  %v987_v20 = vadd.f32 1.0, %v1817_v57 }
 0x43d   :  { %1822 = vrcp.f32 %v980_v59 }
 0x43e   :  { %1824 = vrcp.f32 %v987_v20  ;;  %v2465_v20 = vld [vmem:[#allocation3 + $0x8] ss:$16 sps:$4 sm:$0xff]  }
 0x446   :  { %v1821_v2 = vpop.eup %1820 }
 0x447   :  { %v1823_v25 = vpop.eup %1822  ;;  %v991_v30 = vmul.f32 %v1821_v2, %v1819_v60 }
 0x448   :  { %v990_v5 = vmul.f32 %v1823_v25, %v2375_v35  ;;  %v1825_v46 = vpop.eup %1824  ;;  %v2583_v35 = vld [vmem:[#allocation14_spill] sm:$0xff] }
 0x44a   :  { %v2417_v40 = vadd.f32 %v991_v30, %v990_v5  ;;  %v2462_v30 = vld [vmem:[#allocation3] ss:$16 sps:$4 sm:$0xff]   ;;  %v2468_v5 = vld [vmem:[#allocation3 + $0x24] ss:$16 sps:$4 sm:$0xff]  }
 0x44c   :  { %1826 = vtanh.f32 %v2417_v40 }
 0x456   :  { %v1827_v15 = vpop.eup %1826 }
 0x457   :  { %v994_v47 = vmul.f32 %v1827_v15, %v1825_v46  ;;  %v2476_v46 = vld [vmem:[#allocation3 + $0x20] ss:$16 sps:$4 sm:$0xff]   ;;  %v2479_v15 = vld [vmem:[#allocation3 + $0x28] ss:$16 sps:$4 sm:$0xff]  }
 0x459   :  { %v1000_v48 = vpack.c.bf16 %v994_v47, %v994_v47  ;;  %v2482_v47 = vld [vmem:[#allocation3 + $0x44] ss:$16 sps:$4 sm:$0xff]  }
 0x45b   :  { %1034 = vmatmul.mubr.bf16.vlgmr.msra.gmra.mrb[32].mxu0 %v1000_v48  ;;  %1075 = vmatmul.mubr.bf16.vlgmr.msra.gmra.mrb[32].mxu1 %v1000_v48  ;;  %v2485_v48 = vld [vmem:[#allocation3 + $0x4c] ss:$16 sps:$4 sm:$0xff]  }
 0x45c   :  { %1118 = vmatpush1.bf16.msra.mxu0 %v2054_v8  ;;  %1159 = vmatpush1.bf16.msra.mxu1 %v2057_v9 }
 0x45d   :  { %1119 = vmatprep.subr.bf16.mxu0 %v2065_v11  ;;  %1160 = vmatprep.subr.bf16.mxu1 %v2069_v12  ;;  %v2580_v11 = vld [vmem:[#allocation11_spill] sm:$0xff] }
 0x45e   :  { %1149 = vmatprep.mubr.bf16.mxu0 %v2577_v45  ;;  %1190 = vmatprep.mubr.bf16.mxu1 %v2577_v45 }
 0x460   :  { %1120 = vmatpush1.bf16.msra.mxu0 %v2071_v13  ;;  %1161 = vmatpush1.bf16.msra.mxu1 %v2075_v14  ;;  %v2581_v13 = vld [vmem:[#allocation12_spill] sm:$0xff] }
 0x461   :  { %1121 = vmatprep.subr.bf16.mxu0 %v2082_v16  ;;  %1162 = vmatprep.subr.bf16.mxu1 %v2086_v17 }
 0x464   :  { %1122 = vmatpush1.bf16.msra.mxu0 %v2088_v18  ;;  %1163 = vmatpush1.bf16.msra.mxu1 %v2092_v19  ;;  %v2582_v18 = vld [vmem:[#allocation13_spill] sm:$0xff] }
 0x465   :  { %1123 = vmatprep.subr.bf16.mxu0 %v2101_v21  ;;  %1164 = vmatprep.subr.bf16.mxu1 %v2103_v22 }
 0x468   :  { %1124 = vmatpush1.bf16.msra.mxu0 %v2107_v23  ;;  %1165 = vmatpush1.bf16.msra.mxu1 %v2111_v24 }
 0x469   :  { %1125 = vmatprep.subr.bf16.mxu0 %v2120_v26  ;;  %1166 = vmatprep.subr.bf16.mxu1 %v2122_v27 }
 0x46c   :  { %1126 = vmatpush1.bf16.msra.mxu0 %v2126_v28  ;;  %1167 = vmatpush1.bf16.msra.mxu1 %v2130_v29 }
 0x46d   :  { %1127 = vmatprep.subr.bf16.mxu0 %v2137_v31  ;;  %1168 = vmatprep.subr.bf16.mxu1 %v2141_v32 }
 0x470   :  { %1128 = vmatpush1.bf16.msra.mxu0 %v2145_v33  ;;  %1169 = vmatpush1.bf16.msra.mxu1 %v2149_v34 }
 0x471   :  { %1129 = vmatprep.subr.bf16.mxu0 %v2158_v36  ;;  %1170 = vmatprep.subr.bf16.mxu1 %v2160_v37 }
 0x474   :  { %1130 = vmatpush1.bf16.msra.mxu0 %v2164_v38  ;;  %1171 = vmatpush1.bf16.msra.mxu1 %v2168_v39 }
 0x475   :  { %1131 = vmatprep.subr.bf16.mxu0 %v2177_v41  ;;  %1172 = vmatprep.subr.bf16.mxu1 %v2179_v42 }
 0x478   :  { %1132 = vmatpush1.bf16.msra.mxu0 %v2183_v43  ;;  %1173 = vmatpush1.bf16.msra.mxu1 %v2187_v44 }
 0x479   :  { %1233 = vmatprep.subr.bf16.mxu0 %v2048_v6  ;;  %1274 = vmatprep.subr.bf16.mxu1 %v2052_v7 }
 0x52e   :  { %v1035_v8 = vpop.f32.mrb[32].mxu0  ;;  %v1076_v9 = vpop.f32.mrb[32].mxu1 }
 0x52f   :  { %v1083_v12 = vadd.f32 %v1035_v8, %v2580_v11  ;;  %v1085_v14 = vadd.f32 %v1076_v9, %v2581_v13  ;;  %v1037_v16 = vpop.f32.mrb[33].mxu0  ;;  %v1078_v17 = vpop.f32.mrb[33].mxu1  ;;  %v2488_v8 = vld [vmem:[#allocation3 + $0x40] ss:$16 sps:$4 sm:$0xff]   ;;  %v2491_v9 = vld [vmem:[#allocation3 + $0x48] ss:$16 sps:$4 sm:$0xff]  }
 0x530   :  { %v1084_v19 = vadd.f32 %v1037_v16, %v2582_v18  ;;  %v1086_v3 = vadd.f32 %v1078_v17, %v2583_v35  ;;  %v1039_v4 = vpop.f32.mrb[34].mxu0  ;;  %v1080_v49 = vpop.f32.mrb[34].mxu1 }
 0x531   :  { %v1617_v62 = vmul.f32 -1.442695, %v1083_v12  ;;  %v1040_v1 = vpop.f32.mrb[35].mxu0  ;;  %v1081_v61 = vpop.f32.mrb[35].mxu1 }
 0x532   :  { %v1618_v6 = vmul.f32 -1.442695, %v1084_v19  ;;  %v1619_v7 = vmul.f32 -1.442695, %v1086_v3 }
 0x533   :  { %1828 = vpow2.f32 %v1617_v62 }
 0x534   :  { %1830 = vpow2.f32 %v1618_v6 }
 0x535   :  { %1832 = vpow2.f32 %v1619_v7 }
 0x536   :  { %1834 = vtanh.f32 %v1085_v14 }
 0x53d   :  { %v1829_v50 = vpop.eup %1828 }
 0x53e   :  { %v1831_v51 = vpop.eup %1830  ;;  %v1090_v52 = vadd.f32 1.0, %v1829_v50  ;;  %v1904_v50 = vld [vmem:[#allocation3 + $0x64] ss:$16 sps:$4 sm:$0xff]  }
 0x53f   :  { %v1096_v63 = vadd.f32 1.0, %v1831_v51  ;;  %v1833_v53 = vpop.eup %1832  ;;  %v1905_v51 = vld [vmem:[#allocation3 + $0x6c] ss:$16 sps:$4 sm:$0xff]  }
 0x540   :  { %1836 = vrcp.f32 %v1090_v52  ;;  %v1835_v0 = vpop.eup %1834  ;;  %v1103_v10 = vadd.f32 1.0, %v1833_v53  ;;  %v1906_v52 = vld [vmem:[#allocation3 + $0x60] ss:$16 sps:$4 sm:$0xff]   ;;  %v1909_v53 = vld [vmem:[#allocation3 + $0x8c] ss:$16 sps:$4 sm:$0xff]  }
 0x541   :  { %1838 = vrcp.f32 %v1096_v63  ;;  %v1907_v63 = vld [vmem:[#allocation3 + $0x68] ss:$16 sps:$4 sm:$0xff]  }
 0x542   :  { %1840 = vrcp.f32 %v1103_v10  ;;  %v1914_v10 = vld [vmem:[#allocation3 + $0xa0] ss:$16 sps:$4 sm:$0xff]  }
 0x54a   :  { %v1837_v54 = vpop.eup %1836 }
 0x54b   :  { %v1839_v55 = vpop.eup %1838  ;;  %v1107_v56 = vmul.f32 %v1837_v54, %v1835_v0  ;;  %v1910_v0 = vld [vmem:[#allocation3 + $0x80] ss:$16 sps:$4 sm:$0xff]   ;;  %v1911_v54 = vld [vmem:[#allocation3 + $0x88] ss:$16 sps:$4 sm:$0xff]  }
 0x54c   :  { %v1106_v58 = vmul.f32 %v1839_v55, %v2417_v40  ;;  %v1841_v57 = vpop.eup %1840  ;;  %v2471_v40 = vld [vmem:[#allocation3 + $0x2c] ss:$16 sps:$4 sm:$0xff]   ;;  %v1912_v55 = vld [vmem:[#allocation3 + $0xa4] ss:$16 sps:$4 sm:$0xff]  }
 0x54e   :  { %v2459_v59 = vadd.f32 %v1107_v56, %v1106_v58  ;;  %v1913_v56 = vld [vmem:[#allocation3 + $0xac] ss:$16 sps:$4 sm:$0xff]   ;;  %v1915_v58 = vld [vmem:[#allocation3 + $0xa8] ss:$16 sps:$4 sm:$0xff]  }
 0x550   :  { %1842 = vtanh.f32 %v2459_v59 }
 0x55a   :  { %v1843_v60 = vpop.eup %1842 }
 0x55b   :  { %v1110_v2 = vmul.f32 %v1843_v60, %v1841_v57  ;;  %v1917_v57 = vld [vmem:[#allocation3 + $0xcc] ss:$16 sps:$4 sm:$0xff]   ;;  %v1918_v60 = vld [vmem:[#allocation3 + $0xc0] ss:$16 sps:$4 sm:$0xff]  }
 0x55d   :  { %v1116_v25 = vpack.c.bf16 %v1110_v2, %v1110_v2  ;;  %v1919_v2 = vld [vmem:[#allocation3 + $0xc8] ss:$16 sps:$4 sm:$0xff]  }
 0x55f   :  { %1150 = vmatmul.mubr.bf16.vlgmr.msra.gmra.mrb[36].mxu0 %v1116_v25  ;;  %1191 = vmatmul.mubr.bf16.vlgmr.msra.gmra.mrb[36].mxu1 %v1116_v25  ;;  %v1920_v25 = vld [vmem:[#allocation3 + $0xe4] ss:$16 sps:$4 sm:$0xff]  }
 0x560   :  { %1234 = vmatpush1.bf16.msra.mxu0 %v2462_v30  ;;  %1275 = vmatpush1.bf16.msra.mxu1 %v2465_v20 }
 0x561   :  { %1235 = vmatprep.subr.bf16.mxu0 %v2468_v5  ;;  %1276 = vmatprep.subr.bf16.mxu1 %v2471_v40 }
 0x562   :  { %1265 = vmatprep.mubr.bf16.mxu0 %v2577_v45  ;;  %1306 = vmatprep.mubr.bf16.mxu1 %v2577_v45 }
 0x564   :  { %1236 = vmatpush1.bf16.msra.mxu0 %v2476_v46  ;;  %1277 = vmatpush1.bf16.msra.mxu1 %v2479_v15 }
 0x565   :  { %1237 = vmatprep.subr.bf16.mxu0 %v2482_v47  ;;  %1278 = vmatprep.subr.bf16.mxu1 %v2485_v48 }
 0x568   :  { %1238 = vmatpush1.bf16.msra.mxu0 %v2488_v8  ;;  %1279 = vmatpush1.bf16.msra.mxu1 %v2491_v9 }
 0x569   :  { %1239 = vmatprep.subr.bf16.mxu0 %v2101_v21  ;;  %1280 = vmatprep.subr.bf16.mxu1 %v2103_v22  ;;  %v1902_v21 = vld [vmem:[#allocation3 + $0x4] ss:$16 sps:$4 sm:$0xff]   ;;  %v1903_v22 = vld [vmem:[#allocation3 + $0xc] ss:$16 sps:$4 sm:$0xff]  }
 0x56c   :  { %1240 = vmatpush1.bf16.msra.mxu0 %v2107_v23  ;;  %1281 = vmatpush1.bf16.msra.mxu1 %v2111_v24 }
 0x56d   :  { %1241 = vmatprep.subr.bf16.mxu0 %v2120_v26  ;;  %1282 = vmatprep.subr.bf16.mxu1 %v2122_v27  ;;  %v2584_v26 = vld [vmem:[#allocation15_spill] sm:$0xff] }
 0x570   :  { %1242 = vmatpush1.bf16.msra.mxu0 %v2126_v28  ;;  %1283 = vmatpush1.bf16.msra.mxu1 %v2130_v29  ;;  %v2585_v28 = vld [vmem:[#allocation16_spill] sm:$0xff] }
 0x571   :  { %1243 = vmatprep.subr.bf16.mxu0 %v2137_v31  ;;  %1284 = vmatprep.subr.bf16.mxu1 %v2141_v32 }
 0x574   :  { %1244 = vmatpush1.bf16.msra.mxu0 %v2145_v33  ;;  %1285 = vmatpush1.bf16.msra.mxu1 %v2149_v34  ;;  %v2586_v33 = vld [vmem:[#allocation17_spill] sm:$0xff] }
 0x575   :  { %1245 = vmatprep.subr.bf16.mxu0 %v2158_v36  ;;  %1286 = vmatprep.subr.bf16.mxu1 %v2160_v37  ;;  %v2587_v36 = vld [vmem:[#allocation18_spill] sm:$0xff] }
 0x578   :  { %1246 = vmatpush1.bf16.msra.mxu0 %v2164_v38  ;;  %1287 = vmatpush1.bf16.msra.mxu1 %v2168_v39 }
 0x579   :  { %1247 = vmatprep.subr.bf16.mxu0 %v2177_v41  ;;  %1288 = vmatprep.subr.bf16.mxu1 %v2179_v42 }
 0x57c   :  { %1248 = vmatpush1.bf16.msra.mxu0 %v2183_v43  ;;  %1289 = vmatpush1.bf16.msra.mxu1 %v2187_v44 }
 0x57d   :  { %1349 = vmatprep.subr.bf16.mxu0 %v1902_v21  ;;  %1390 = vmatprep.subr.bf16.mxu1 %v1903_v22  ;;  %v2590_v22 = vld [vmem:[#allocation21_spill] sm:$0xff] }
 0x632   :  { %v1151_v23 = vpop.f32.mrb[36].mxu0  ;;  %v1192_v24 = vpop.f32.mrb[36].mxu1 }
 0x633   :  { %v1199_v27 = vadd.f32 %v1151_v23, %v2584_v26  ;;  %v1201_v29 = vadd.f32 %v1192_v24, %v2585_v28  ;;  %v1153_v31 = vpop.f32.mrb[37].mxu0  ;;  %v1194_v32 = vpop.f32.mrb[37].mxu1  ;;  %v2591_v24 = vld [vmem:[#allocation22_spill] sm:$0xff] }
 0x634   :  { %v1200_v34 = vadd.f32 %v1153_v31, %v2586_v33  ;;  %v1202_v37 = vadd.f32 %v1194_v32, %v2587_v36  ;;  %v1155_v38 = vpop.f32.mrb[38].mxu0  ;;  %v1196_v39 = vpop.f32.mrb[38].mxu1 }
 0x635   :  { %v1620_v41 = vmul.f32 -1.442695, %v1199_v27  ;;  %v1156_v42 = vpop.f32.mrb[39].mxu0  ;;  %v1197_v43 = vpop.f32.mrb[39].mxu1 }
 0x636   :  { %v1621_v44 = vmul.f32 -1.442695, %v1200_v34  ;;  %v1622_v11 = vmul.f32 -1.442695, %v1202_v37 }
 0x637   :  { %1844 = vpow2.f32 %v1620_v41 }
 0x638   :  { %1846 = vpow2.f32 %v1621_v44 }
 0x639   :  { %1848 = vpow2.f32 %v1622_v11 }
 0x63a   :  { %1850 = vtanh.f32 %v1201_v29 }
 0x641   :  { %v1845_v12 = vpop.eup %1844 }
 0x642   :  { %v1847_v13 = vpop.eup %1846  ;;  %v1206_v14 = vadd.f32 1.0, %v1845_v12 }
 0x643   :  { %v1212_v16 = vadd.f32 1.0, %v1847_v13  ;;  %v1849_v17 = vpop.eup %1848 }
 0x644   :  { %1852 = vrcp.f32 %v1206_v14  ;;  %v1851_v18 = vpop.eup %1850  ;;  %v1219_v4 = vadd.f32 1.0, %v1849_v17 }
 0x645   :  { %1854 = vrcp.f32 %v1212_v16 }
 0x646   :  { %1856 = vrcp.f32 %v1219_v4 }
 0x64e   :  { %v1853_v19 = vpop.eup %1852 }
 0x64f   :  { %v1855_v35 = vpop.eup %1854  ;;  %v1223_v3 = vmul.f32 %v1853_v19, %v1851_v18 }
 0x650   :  { %v1222_v49 = vmul.f32 %v1855_v35, %v2459_v59  ;;  %v1857_v1 = vpop.eup %1856  ;;  %v1916_v59 = vld [vmem:[#allocation3 + $0xc4] ss:$16 sps:$4 sm:$0xff]  }
 0x651   :  { %v1459_v35 = vld [vmem:[#allocation5] sm:$0xff] }
 0x652   :  { %v2519_v62 = vadd.f32 %v1223_v3, %v1222_v49  ;;  %v1460_v3 = vld [vmem:[#allocation5 + $0x8] sm:$0xff]  ;;  %v1980_v49 = vmov 0.0|0.0  }
 0x653   :  { %v1683_v4 = vpack.c.bf16 %v1460_v3, %v1459_v35 }
 0x654   :  { %1858 = vtanh.f32 %v2519_v62 }
 0x65e   :  { %v1859_v61 = vpop.eup %1858 }
 0x65f   :  { %v1226_v6 = vmul.f32 %v1859_v61, %v1857_v1  ;;  %v1461_v1 = vld [vmem:[#allocation5 + $0x10] sm:$0xff] }
 0x661   :  { %v1232_v7 = vpack.c.bf16 %v1226_v6, %v1226_v6  ;;  %v1463_v6 = vld [vmem:[#allocation5 + $0x20] sm:$0xff] }
 0x663   :  { %1266 = vmatmul.mubr.bf16.vlgmr.msra.gmra.mrb[40].mxu0 %v1232_v7  ;;  %1307 = vmatmul.mubr.bf16.vlgmr.msra.gmra.mrb[40].mxu1 %v1232_v7  ;;  %v1464_v7 = vld [vmem:[#allocation5 + $0x28] sm:$0xff] }
 0x664   :  { %1350 = vmatpush1.bf16.msra.mxu0 %v2462_v30  ;;  %1391 = vmatpush1.bf16.msra.mxu1 %v2465_v20  ;;  %v1921_v30 = vld [vmem:[#allocation3 + $0xec] ss:$16 sps:$4 sm:$0xff]   ;;  %v1922_v20 = vld [vmem:[#allocation3 + $0xe0] ss:$16 sps:$4 sm:$0xff]  }
 0x665   :  { %1351 = vmatprep.subr.bf16.mxu0 %v2468_v5  ;;  %1392 = vmatprep.subr.bf16.mxu1 %v2471_v40  ;;  %v1923_v5 = vld [vmem:[#allocation3 + $0xe8] ss:$16 sps:$4 sm:$0xff]  }
 0x666   :  { %1381 = vmatprep.mubr.bf16.mxu0 %v2577_v45  ;;  %1422 = vmatprep.mubr.bf16.mxu1 %v2577_v45  ;;  %v1908_v45 = vld [vmem:[#allocation3 + $0x84] ss:$16 sps:$4 sm:$0xff]  }
 0x668   :  { %1352 = vmatpush1.bf16.msra.mxu0 %v2476_v46  ;;  %1393 = vmatpush1.bf16.msra.mxu1 %v2479_v15  ;;  %v2588_v15 = vld [vmem:[#allocation19_spill] sm:$0xff] }
 0x669   :  { %1353 = vmatprep.subr.bf16.mxu0 %v2482_v47  ;;  %1394 = vmatprep.subr.bf16.mxu1 %v2485_v48  ;;  %v2589_v48 = vld [vmem:[#allocation20_spill] sm:$0xff] }
 0x66c   :  { %1354 = vmatpush1.bf16.msra.mxu0 %v2488_v8  ;;  %1395 = vmatpush1.bf16.msra.mxu1 %v2491_v9 }
 0x66d   :  { %1355 = vmatprep.subr.bf16.mxu0 %v1904_v50  ;;  %1396 = vmatprep.subr.bf16.mxu1 %v1905_v51  ;;  %v1689_v50 = vpack.c.bf16 %v1464_v7, %v1463_v6  ;;  %v1465_v51 = vld [vmem:[#allocation5 + $0x30] sm:$0xff] }
 0x670   :  { %1356 = vmatpush1.bf16.msra.mxu0 %v1906_v52  ;;  %1397 = vmatpush1.bf16.msra.mxu1 %v1907_v63  ;;  %v1466_v52 = vld [vmem:[#allocation5 + $0x38] sm:$0xff] }
 0x671   :  { %1357 = vmatprep.subr.bf16.mxu0 %v1908_v45  ;;  %1398 = vmatprep.subr.bf16.mxu1 %v1909_v53  ;;  %v1692_v63 = vpack.c.bf16 %v1466_v52, %v1465_v51  ;;  %v1467_v45 = vld [vmem:[#allocation5 + $0x40] sm:$0xff]  ;;  %v1468_v53 = vld [vmem:[#allocation5 + $0x48] sm:$0xff] }
 0x674   :  { %1358 = vmatpush1.bf16.msra.mxu0 %v1910_v0  ;;  %1399 = vmatpush1.bf16.msra.mxu1 %v1911_v54  ;;  %v1695_v0 = vpack.c.bf16 %v1468_v53, %v1467_v45  ;;  %v1469_v54 = vld [vmem:[#allocation5 + $0x50] sm:$0xff] }
 0x675   :  { %1359 = vmatprep.subr.bf16.mxu0 %v1912_v55  ;;  %1400 = vmatprep.subr.bf16.mxu1 %v1913_v56  ;;  %v1470_v55 = vld [vmem:[#allocation5 + $0x58] sm:$0xff]  ;;  %v1471_v56 = vld [vmem:[#allocation5 + $0x60] sm:$0xff] }
 0x678   :  { %1360 = vmatpush1.bf16.msra.mxu0 %v1914_v10  ;;  %1401 = vmatpush1.bf16.msra.mxu1 %v1915_v58  ;;  %v1698_v10 = vpack.c.bf16 %v1470_v55, %v1469_v54  ;;  %v1472_v58 = vld [vmem:[#allocation5 + $0x68] sm:$0xff] }
 0x679   :  { %1361 = vmatprep.subr.bf16.mxu0 %v1916_v59  ;;  %1402 = vmatprep.subr.bf16.mxu1 %v1917_v57  ;;  %v2592_v59 = vmov 0.0   ;;  %v1701_v57 = vpack.c.bf16 %v1472_v58, %v1471_v56 }
 0x67c   :  { %1362 = vmatpush1.bf16.msra.mxu0 %v1918_v60  ;;  %1403 = vmatpush1.bf16.msra.mxu1 %v1919_v2  ;;  %v1473_v60 = vld [vmem:[#allocation5 + $0x70] sm:$0xff]  ;;  %v1474_v2 = vld [vmem:[#allocation5 + $0x78] sm:$0xff] }
 0x67d   :  { %1363 = vmatprep.subr.bf16.mxu0 %v1920_v25  ;;  %1404 = vmatprep.subr.bf16.mxu1 %v1921_v30  ;;  %v1704_v25 = vpack.c.bf16 %v1474_v2, %v1473_v60 }
 0x680   :  { %1364 = vmatpush1.bf16.msra.mxu0 %v1922_v20  ;;  %1405 = vmatpush1.bf16.msra.mxu1 %v1923_v5  ;;  %v2593_v5 = vld [vmem:[#allocation23_spill] sm:$0xff] }
 0x681   :  { %1682 = vmatprep.subr.bf16.mxu0 %v1980_v49 }
 0x736   :  { %v1267_v40 = vpop.f32.mrb[40].mxu0  ;;  %v1308_v46 = vpop.f32.mrb[40].mxu1 }
 0x737   :  { %v1315_v47 = vadd.f32 %v1267_v40, %v2588_v15  ;;  %v1317_v8 = vadd.f32 %v1308_v46, %v2589_v48  ;;  %v1269_v9 = vpop.f32.mrb[41].mxu0  ;;  %v1310_v21 = vpop.f32.mrb[41].mxu1  ;;  %v2594_v46 = vld [vmem:[#allocation24_spill] sm:$0xff] }
 0x738   :  { %v1316_v23 = vadd.f32 %v1269_v9, %v2590_v22  ;;  %v1318_v26 = vadd.f32 %v1310_v21, %v2591_v24  ;;  %v1271_v27 = vpop.f32.mrb[42].mxu0  ;;  %v1312_v28 = vpop.f32.mrb[42].mxu1  ;;  %v2596_v21 = vld [vmem:[#allocation26_spill] sm:$0xff] }
 0x739   :  { %v1623_v29 = vmul.f32 -1.442695, %v1315_v47  ;;  %v1272_v31 = vpop.f32.mrb[43].mxu0  ;;  %v1313_v32 = vpop.f32.mrb[43].mxu1 }
 0x73a   :  { %v1624_v33 = vmul.f32 -1.442695, %v1316_v23  ;;  %v1625_v34 = vmul.f32 -1.442695, %v1318_v26 }
 0x73b   :  { %1860 = vpow2.f32 %v1623_v29 }
 0x73c   :  { %1862 = vpow2.f32 %v1624_v33 }
 0x73d   :  { %1864 = vpow2.f32 %v1625_v34 }
 0x73e   :  { %1866 = vtanh.f32 %v1317_v8  ;;  %v2595_v8 = vld [vmem:[#allocation25_spill] sm:$0xff] }
 0x745   :  { %v1861_v36 = vpop.eup %1860 }
 0x746   :  { %v1863_v37 = vpop.eup %1862  ;;  %v1322_v38 = vadd.f32 1.0, %v1861_v36 }
 0x747   :  { %v1328_v39 = vadd.f32 1.0, %v1863_v37  ;;  %v1865_v41 = vpop.eup %1864 }
 0x748   :  { %1868 = vrcp.f32 %v1322_v38  ;;  %v1867_v42 = vpop.eup %1866  ;;  %v1335_v12 = vadd.f32 1.0, %v1865_v41 }
 0x749   :  { %1870 = vrcp.f32 %v1328_v39 }
 0x74a   :  { %1872 = vrcp.f32 %v1335_v12 }
 0x752   :  { %v1869_v43 = vpop.eup %1868 }
 0x753   :  { %v1871_v44 = vpop.eup %1870  ;;  %v1339_v11 = vmul.f32 %v1869_v43, %v1867_v42 }
 0x754   :  { %v1338_v13 = vmul.f32 %v1871_v44, %v2519_v62  ;;  %v1873_v16 = vpop.eup %1872  ;;  %v1462_v62 = vld [vmem:[#allocation5 + $0x18] sm:$0xff] }
 0x755   :  { %v1686_v61 = vpack.c.bf16 %v1462_v62, %v1461_v1 }
 0x756   :  { %v2539_v14 = vadd.f32 %v1339_v11, %v1338_v13 }
 0x758   :  { %1874 = vtanh.f32 %v2539_v14 }
 0x762   :  { %v1875_v17 = vpop.eup %1874 }
 0x763   :  { %v1342_v18 = vmul.f32 %v1875_v17, %v1873_v16  ;;  %v1629_v17 = vld [vmem:[#allocation5 + $0x80] ss:$0 sm:$0xff] }
 0x765   :  { %v1348_v19 = vpack.c.bf16 %v1342_v18, %v1342_v18 }
 0x767   :  { %1382 = vmatmul.mubr.bf16.vlgmr.msra.gmra.mrb[44].mxu0 %v1348_v19  ;;  %1423 = vmatmul.mubr.bf16.vlgmr.msra.gmra.mrb[44].mxu1 %v1348_v19 }
 0x768   :  { %1684 = vmatpush3.bf16.msra.mxu0 %v1683_v4  ;;  %1679 = vmatprep.mubr.msk.f32.mxu0 %vm1981_vm1, %v2592_v59 }
 0x769   :  { %1685 = vmatprep.subr.bf16.mxu0 %v1980_v49 }
 0x76c   :  { %1687 = vmatpush3.bf16.msra.mxu0 %v1686_v61 }
 0x76d   :  { %1688 = vmatprep.subr.bf16.mxu0 %v1980_v49 }
 0x770   :  { %1690 = vmatpush3.bf16.msra.mxu0 %v1689_v50 }
 0x771   :  { %1691 = vmatprep.subr.bf16.mxu0 %v1980_v49 }
 0x774   :  { %1693 = vmatpush3.bf16.msra.mxu0 %v1692_v63 }
 0x775   :  { %1694 = vmatprep.subr.bf16.mxu0 %v1980_v49 }
 0x778   :  { %1696 = vmatpush3.bf16.msra.mxu0 %v1695_v0 }
 0x779   :  { %1697 = vmatprep.subr.bf16.mxu0 %v1980_v49 }
 0x77c   :  { %1699 = vmatpush3.bf16.msra.mxu0 %v1698_v10 }
 0x77d   :  { %1700 = vmatprep.subr.bf16.mxu0 %v1980_v49 }
 0x780   :  { %1702 = vmatpush3.bf16.msra.mxu0 %v1701_v57 }
 0x781   :  { %1703 = vmatprep.subr.bf16.mxu0 %v1980_v49 }
 0x784   :  { %1705 = vmatpush3.bf16.msra.mxu0 %v1704_v25 }
 0x83a   :  { %v1383_v30 = vpop.f32.mrb[44].mxu0  ;;  %v1424_v20 = vpop.f32.mrb[44].mxu1 }
 0x83b   :  { %v1431_v40 = vadd.f32 %v1383_v30, %v2593_v5  ;;  %v1433_v15 = vadd.f32 %v1424_v20, %v2594_v46  ;;  %v1385_v47 = vpop.f32.mrb[45].mxu0  ;;  %v1426_v48 = vpop.f32.mrb[45].mxu1 }
 0x83c   :  { %v1432_v9 = vadd.f32 %v1385_v47, %v2595_v8  ;;  %v1434_v22 = vadd.f32 %v1426_v48, %v2596_v21  ;;  %v1387_v23 = vpop.f32.mrb[46].mxu0  ;;  %v1428_v24 = vpop.f32.mrb[46].mxu1 }
 0x83d   :  { %v1626_v26 = vmul.f32 -1.442695, %v1431_v40  ;;  %v1388_v27 = vpop.f32.mrb[47].mxu0  ;;  %v1429_v28 = vpop.f32.mrb[47].mxu1 }
 0x83e   :  { %v1627_v29 = vmul.f32 -1.442695, %v1432_v9  ;;  %v1628_v31 = vmul.f32 -1.442695, %v1434_v22 }
 0x83f   :  { %1876 = vpow2.f32 %v1626_v26 }
 0x840   :  { %1878 = vpow2.f32 %v1627_v29 }
 0x841   :  { %1880 = vpow2.f32 %v1628_v31 }
 0x842   :  { %1882 = vtanh.f32 %v1433_v15 }
 0x849   :  { %v1877_v32 = vpop.eup %1876 }
 0x84a   :  { %v1879_v33 = vpop.eup %1878  ;;  %v1438_v34 = vadd.f32 1.0, %v1877_v32 }
 0x84b   :  { %v1444_v36 = vadd.f32 1.0, %v1879_v33  ;;  %v1881_v37 = vpop.eup %1880 }
 0x84c   :  { %1884 = vrcp.f32 %v1438_v34  ;;  %v1883_v38 = vpop.eup %1882  ;;  %v1451_v43 = vadd.f32 1.0, %v1881_v37 }
 0x84d   :  { %1886 = vrcp.f32 %v1444_v36 }
 0x84e   :  { %1888 = vrcp.f32 %v1451_v43 }
 0x856   :  { %v1885_v39 = vpop.eup %1884 }
 0x857   :  { %v1887_v41 = vpop.eup %1886  ;;  %v1455_v42 = vmul.f32 %v1885_v39, %v1883_v38 }
 0x858   :  { %v1454_v44 = vmul.f32 %v1887_v41, %v2539_v14  ;;  %v1889_v12 = vpop.eup %1888 }
 0x85a   :  { %v1456_v11 = vadd.f32 %v1455_v42, %v1454_v44 }
 0x85c   :  { %1890 = vtanh.f32 %v1456_v11 }
 0x866   :  { %v1891_v13 = vpop.eup %1890 }
 0x867   :  { %v1458_v16 = vmul.f32 %v1891_v13, %v1889_v12 }
 0x869   :  { %1680 = vmatmul.mubr.f32.vlgmr.msra.gmra.mrb[48].mxu0 %v1458_v16 }
 0x93c   :  { %v1546_v18 = vpop.f32.mrb[48].mxu0 }
 0x93d   :  { %v1547_v19 = vadd.f32 %v1629_v17, %v1546_v18  ;;  %v1681_v35 = vpop.f32.mrb[49].mxu0 }
 0x93f   :  { %1550 = vst [vmem:[%s2555_s4] sm:$0xff] %v1547_v19 }
 0x940   :  { %1555 = vsyncpa [#allocation4], 1 }
 0x941   :  { %1556 = vsyncpa [#allocation6], 1 }

</bundles_post_ra>
